<compile_context>
chip_gen: v6e
topology: v6e:2x2x1
jax: 0.10.0
libtpu: 0.0.40
codegen_flags: <defaults>
</compile_context>

<pallas_src>
import functools

import jax
import jax.numpy as jnp
import numpy as np
from jax.experimental import pallas as pl
from jax.experimental.pallas import tpu as pltpu

_EPS = 1e-5
_SLOPE = 0.01   # default negative_slope of F.leaky_relu / nn.LeakyReLU


def _round_up(v, m):
    return (v + m - 1) // m * m


# ----------------------------- fused ResPath kernel -----------------------------
def _respath_kernel(x_ref, w1_ref, wr_ref, mask_ref, o_ref, col_ref, *,
                    cin_p, cout_p, kp, n_valid, taps, length, eps, slope):
    """Fused ResPath (all `length` ResBlocks) for one batch element.

    x_ref   : (1, cin_p, S_pad)   channel-padded, spatially-flattened input   (VMEM)
    w1_ref  : (2*cout_p, kp)      block-1 packed [conv3x3 ; conv1x1] weights  (VMEM)
    wr_ref  : (2*cout_p, kp)      shared repeated-block packed weights        (VMEM)
    mask_ref: (27, S_pad)         per-tap 0/1 validity masks                  (VMEM)
    o_ref   : (1, cout_p, S_pad)  output                                      (VMEM)
    col_ref : (kp, S_pad)         im2col scratch                              (VMEM)
    """
    s_pad = x_ref.shape[-1]
    inv_n = 1.0 / float(n_valid)
    lane_masked = (s_pad != n_valid)                      # compile-time flag
    lane_valid = mask_ref[13:14, :] if lane_masked else None   # centre tap == "real voxel"

    # Rows never written by the im2col build must be exact zeros: their weight columns
    # are zero, but 0 * (uninitialized NaN/Inf) would still poison the matmul.
    zero_from = 27 * min(cin_p, cout_p)
    if zero_from < kp:
        col_ref[zero_from:, :] = jnp.zeros((kp - zero_from, s_pad), jnp.float32)

    def inorm(y):   # InstanceNorm3d (no affine), biased variance, per-channel (= per sublane row)
        m = jnp.sum(y, axis=1, keepdims=True) * inv_n
        msq = jnp.sum(y * y, axis=1, keepdims=True) * inv_n
        var = jnp.maximum(msq - m * m, 0.0)
        out = (y - m) * jax.lax.rsqrt(var + eps)
        if lane_masked:
            out = out * lane_valid                        # keep padded lanes at exactly 0
        return out

    def leaky(y):
        return jnp.where(y >= 0.0, y, y * slope)

    def res_block(x_val, c_rows, w_ref):
        # im2col: row (tap*c_rows + ci) = channel ci shifted by the tap offset, halo-masked.
        for tap, (off, needs_mask) in enumerate(taps):
            shifted = x_val if off == 0 else pltpu.roll(x_val, shift=(-off) % s_pad, axis=1)
            if needs_mask:
                shifted = shifted * mask_ref[tap:tap + 1, :]
            col_ref[tap * c_rows:(tap + 1) * c_rows, :] = shifted
        # One MXU matmul yields BOTH convolutions:
        #   rows [0, cout_p)        -> 3x3x3 conv output
        #   rows [cout_p, 2*cout_p) -> 1x1x1 shortcut conv output
        res = jnp.dot(w_ref[...], col_ref[0:kp, :], preferred_element_type=jnp.float32)
        shortcut = inorm(res[cout_p:2 * cout_p, :])       # conv3d_bn(k=1), activation=False
        main = leaky(inorm(res[0:cout_p, :]))             # conv3d_bn(k=3, pad=1), activation=True
        return inorm(leaky(main + shortcut))              # out += shortcut; gn(relu(out))

    act = res_block(x_ref[0], cin_p, w1_ref)              # ResBlock(in_ch -> out_ch)
    for _ in range(length - 1):                           # shared ResBlock(out_ch -> out_ch)
        act = res_block(act, cout_p, wr_ref)
    o_ref[0] = act.astype(o_ref.dtype)


# ----------------------------- host-side helpers -----------------------------
def _build_masks_and_taps(d, h, w, s_pad):
    """Per-tap validity masks (f32 0/1) over the flattened+padded spatial axis."""
    s_valid = d * h * w
    s = np.arange(s_pad)
    z, rem = np.divmod(s, h * w)
    y, x = np.divmod(rem, w)
    in_vol = s < s_valid
    masks = np.zeros((27, s_pad), np.float32)
    taps = []
    t = 0
    for kd in range(3):
        for kh in range(3):
            for kw in range(3):
                dd, dh, dw = kd - 1, kh - 1, kw - 1
                ok = (in_vol
                      & (z + dd >= 0) & (z + dd < d)
                      & (y + dh >= 0) & (y + dh < h)
                      & (x + dw >= 0) & (x + dw < w))
                masks[t] = ok.astype(np.float32)
                taps.append((dd * h * w + dh * w + dw, not bool(ok.all())))
                t += 1
    return masks, tuple(taps)


def _combine_weights(w1, w3, cin_p, cout_p, kp):
    """Pack 3x3x3 + 1x1x1 conv weights into one (2*cout_p, kp) MXU operand.

    Column (tap*cin_p + ci) multiplies im2col row (tap*cin_p + ci).
    Rows [0, cout_p): 3x3x3 conv.  Rows [cout_p, 2*cout_p): 1x1 conv at centre tap (13).
    """
    cout, cin = w1.shape
    w3f = w3.astype(jnp.float32).reshape(cout, cin, 27).transpose(0, 2, 1)   # (cout, 27, cin)
    main = jnp.zeros((cout_p, 27, cin_p), jnp.float32).at[:cout, :, :cin].set(w3f)
    short = jnp.zeros((cout_p, 27, cin_p), jnp.float32).at[:cout, 13, :cin].set(
        w1.astype(jnp.float32))
    packed = jnp.concatenate([main.reshape(cout_p, 27 * cin_p),
                              short.reshape(cout_p, 27 * cin_p)], axis=0)
    return jnp.pad(packed, ((0, 0), (0, kp - 27 * cin_p)))


@functools.partial(jax.jit, static_argnames=("length", "eps", "slope"))
def respath_forward(x, w1_1, w3_1, w1_r, w3_r, *, length, eps=_EPS, slope=_SLOPE):
    """ResPath forward. x: (N, Cin, D, H, W). Shared repeated-block weights as in PyTorch."""
    n, cin, d, h, w = x.shape
    cout = w1_1.shape[0]
    s = d * h * w
    s_pad = _round_up(s, 128)
    cin_p = _round_up(cin, 8)
    cout_p = _round_up(cout, 8)
    kp = _round_up(27 * max(cin_p, cout_p), 128)

    # Flatten spatial onto lanes; pad channels -> multiple of 8, spatial -> multiple of 128.
    x_flat = jnp.pad(x.astype(jnp.float32).reshape(n, cin, s),
                     ((0, 0), (0, cin_p - cin), (0, s_pad - s)))

    w1cat = _combine_weights(w1_1, w3_1, cin_p, cout_p, kp)
    wrcat = _combine_weights(w1_r, w3_r, cout_p, cout_p, kp)

    masks_np, taps = _build_masks_and_taps(d, h, w, s_pad)
    masks = jnp.asarray(masks_np)

    kern = functools.partial(_respath_kernel, cin_p=cin_p, cout_p=cout_p, kp=kp,
                             n_valid=s, taps=taps, length=length, eps=eps, slope=slope)

    flops = 2 * length * n * (2 * cout_p) * kp * s_pad + 12 * length * n * cout_p * s_pad
    bytes_accessed = 4 * (n * cin_p * s_pad + n * cout_p * s_pad
                          + 2 * (2 * cout_p) * kp + 27 * s_pad)

    out = pl.pallas_call(
        kern,
        grid=(n,),
        in_specs=[
            pl.BlockSpec((1, cin_p, s_pad), lambda i: (i, 0, 0)),       # x
            pl.BlockSpec((2 * cout_p, kp), lambda i: (0, 0)),           # block-1 weights
            pl.BlockSpec((2 * cout_p, kp), lambda i: (0, 0)),           # shared block weights
            pl.BlockSpec((27, s_pad), lambda i: (0, 0)),                # tap masks
        ],
        out_specs=pl.BlockSpec((1, cout_p, s_pad), lambda i: (i, 0, 0)),
        out_shape=jax.ShapeDtypeStruct((n, cout_p, s_pad), jnp.float32),
        scratch_shapes=[pltpu.VMEM((kp, s_pad), jnp.float32)],          # im2col scratch
        compiler_params=pltpu.CompilerParams(dimension_semantics=("parallel",)),
        cost_estimate=pl.CostEstimate(flops=int(flops),
                                      transcendentals=int(3 * length * n * cout_p),
                                      bytes_accessed=int(bytes_accessed)),
    )(x_flat, w1cat, wrcat, masks)

    return out[:, :cout, :s].reshape(n, cout, d, h, w)


# ----------------------------- pure-JAX reference -----------------------------
def _conv3d_ref(x, w, padding):
    return jax.lax.conv_general_dilated(
        x, w, window_strides=(1, 1, 1), padding=[(padding, padding)] * 3,
        dimension_numbers=("NCDHW", "OIDHW", "NCDHW"),
        precision=jax.lax.Precision.HIGHEST)


def _inorm_ref(x, eps=_EPS):
    m = jnp.mean(x, axis=(2, 3, 4), keepdims=True)
    v = jnp.mean(jnp.square(x - m), axis=(2, 3, 4), keepdims=True)
    return (x - m) * jax.lax.rsqrt(v + eps)


def _leaky_ref(x, slope=_SLOPE):
    return jnp.where(x >= 0, x, slope * x)


def _resblock_ref(x, w1, w3):
    shortcut = _inorm_ref(_conv3d_ref(x, w1[:, :, None, None, None], 0))
    out = _leaky_ref(_inorm_ref(_conv3d_ref(x, w3, 1)))
    out = out + shortcut
    return _inorm_ref(_leaky_ref(out))


def _respath_ref(x, w1_1, w3_1, w1_r, w3_r, length):
    out = _resblock_ref(x, w1_1, w3_1)
    for _ in range(length - 1):
        out = _resblock_ref(out, w1_r, w3_r)
    return out


if __name__ == "__main__":
    key = jax.random.PRNGKey(0)
    k1, k2, k3, k4, kx = jax.random.split(key, 5)

    # Small shapes consistent with the module: NCDHW volumes, tiny channel counts.
    N, Cin, Cout = 2, 4, 8
    D, H, W = 4, 8, 8
    length = 2

    x = jax.random.normal(kx, (N, Cin, D, H, W), dtype=jnp.float32)

    # ResBlock(in_channel, out_channel) weights (first block).
    w1_1 = jax.random.normal(k1, (Cout, Cin), dtype=jnp.float32) / np.sqrt(Cin)
    w3_1 = jax.random.normal(k2, (Cout, Cin, 3, 3, 3), dtype=jnp.float32) / np.sqrt(Cin * 27)
    # Single shared ResBlock(out_channel, out_channel) instance for the repeated blocks.
    w1_r = jax.random.normal(k3, (Cout, Cout), dtype=jnp.float32) / np.sqrt(Cout)
    w3_r = jax.random.normal(k4, (Cout, Cout, 3, 3, 3), dtype=jnp.float32) / np.sqrt(Cout * 27)

    out = respath_forward(x, w1_1, w3_1, w1_r, w3_r, length=length)
    out = jax.block_until_ready(out)

    ref = jax.block_until_ready(_respath_ref(x, w1_1, w3_1, w1_r, w3_r, length))
    np.testing.assert_allclose(np.asarray(out), np.asarray(ref), rtol=5e-3, atol=5e-3)

    print("KERNEL_OK")
</pallas_src>

<mosaic_0001>
module attributes {stable_mosaic.version = 11 : i64} {
  func.func @_respath_kernel(%arg0: i32, %arg1: memref<1x8x256xf32, #tpu.memory_space<vmem>>, %arg2: memref<16x256xf32, #tpu.memory_space<vmem>>, %arg3: memref<16x256xf32, #tpu.memory_space<vmem>>, %arg4: memref<27x256xf32, #tpu.memory_space<vmem>>, %arg5: memref<1x8x256xf32, #tpu.memory_space<vmem>>, %arg6: memref<256x256xf32, #tpu.memory_space<vmem>>) attributes {dimension_semantics = [#tpu.dimension_semantics<parallel>], iteration_bounds = array<i64: 2>, scalar_prefetch = 0 : i64, scratch_operands = 1 : i64, tpu.core_type = #tpu.core_type<tc>, window_params = [{transform_indices = @transform_0, window_bounds = array<i64: 1, 8, 256>}, {pipeline_mode = #tpu.pipeline_mode<synchronous>, transform_indices = @transform_1, window_bounds = array<i64: 16, 256>}, {pipeline_mode = #tpu.pipeline_mode<synchronous>, transform_indices = @transform_2, window_bounds = array<i64: 16, 256>}, {pipeline_mode = #tpu.pipeline_mode<synchronous>, transform_indices = @transform_3, window_bounds = array<i64: 27, 256>}, {transform_indices = @transform_4, window_bounds = array<i64: 1, 8, 256>}]} {
    %cst = arith.constant 0.000000e+00 : f32
    %0 = vector.broadcast %cst : f32 to vector<40x256xf32>
    %c216 = arith.constant 216 : index
    %c0 = arith.constant 0 : index
    %1 = vector.load %arg6[%c216, %c0] : memref<256x256xf32, #tpu.memory_space<vmem>>, vector<40x256xf32>
    tpu.vector_store %arg6[%c216, %c0], %0 {strides = array<i32>} : memref<256x256xf32, #tpu.memory_space<vmem>>, vector<40x256xf32>,
    %c0_0 = arith.constant 0 : index
    %c0_1 = arith.constant 0 : index
    %c0_2 = arith.constant 0 : index
    %2 = vector.load %arg1[%c0_0, %c0_1, %c0_2] : memref<1x8x256xf32, #tpu.memory_space<vmem>>, vector<1x8x256xf32>
    %3 = vector.shape_cast %2 : vector<1x8x256xf32> to vector<8x256xf32>
    %c73_i32 = arith.constant 73 : i32
    %4 = tpu.dynamic_rotate %3 by %c73_i32 dim 1 : vector<8x256xf32>, i32 -> vector<8x256xf32>
    %c0_3 = arith.constant 0 : index
    %c0_4 = arith.constant 0 : index
    %5 = vector.load %arg4[%c0_3, %c0_4] : memref<27x256xf32, #tpu.memory_space<vmem>>, vector<1x256xf32>
    %6 = vector.broadcast %5 : vector<1x256xf32> to vector<8x256xf32>
    %7 = arith.mulf %4, %6 : vector<8x256xf32>
    %c0_5 = arith.constant 0 : index
    %c0_6 = arith.constant 0 : index
    %8 = vector.load %arg6[%c0_5, %c0_6] : memref<256x256xf32, #tpu.memory_space<vmem>>, vector<8x256xf32>
    tpu.vector_store %arg6[%c0_5, %c0_6], %7 {strides = array<i32>} : memref<256x256xf32, #tpu.memory_space<vmem>>, vector<8x256xf32>,
    %c72_i32 = arith.constant 72 : i32
    %9 = tpu.dynamic_rotate %3 by %c72_i32 dim 1 : vector<8x256xf32>, i32 -> vector<8x256xf32>
    %c1 = arith.constant 1 : index
    %c0_7 = arith.constant 0 : index
    %10 = vector.load %arg4[%c1, %c0_7] : memref<27x256xf32, #tpu.memory_space<vmem>>, vector<1x256xf32>
    %11 = vector.broadcast %10 : vector<1x256xf32> to vector<8x256xf32>
    %12 = arith.mulf %9, %11 : vector<8x256xf32>
    %c8 = arith.constant 8 : index
    %c0_8 = arith.constant 0 : index
    %13 = vector.load %arg6[%c8, %c0_8] : memref<256x256xf32, #tpu.memory_space<vmem>>, vector<8x256xf32>
    tpu.vector_store %arg6[%c8, %c0_8], %12 {strides = array<i32>} : memref<256x256xf32, #tpu.memory_space<vmem>>, vector<8x256xf32>,
    %c71_i32 = arith.constant 71 : i32
    %14 = tpu.dynamic_rotate %3 by %c71_i32 dim 1 : vector<8x256xf32>, i32 -> vector<8x256xf32>
    %c2 = arith.constant 2 : index
    %c0_9 = arith.constant 0 : index
    %15 = vector.load %arg4[%c2, %c0_9] : memref<27x256xf32, #tpu.memory_space<vmem>>, vector<1x256xf32>
    %16 = vector.broadcast %15 : vector<1x256xf32> to vector<8x256xf32>
    %17 = arith.mulf %14, %16 : vector<8x256xf32>
    %c16 = arith.constant 16 : index
    %c0_10 = arith.constant 0 : index
    %18 = vector.load %arg6[%c16, %c0_10] : memref<256x256xf32, #tpu.memory_space<vmem>>, vector<8x256xf32>
    tpu.vector_store %arg6[%c16, %c0_10], %17 {strides = array<i32>} : memref<256x256xf32, #tpu.memory_space<vmem>>, vector<8x256xf32>,
    %c65_i32 = arith.constant 65 : i32
    %19 = tpu.dynamic_rotate %3 by %c65_i32 dim 1 : vector<8x256xf32>, i32 -> vector<8x256xf32>
    %c3 = arith.constant 3 : index
    %c0_11 = arith.constant 0 : index
    %20 = vector.load %arg4[%c3, %c0_11] : memref<27x256xf32, #tpu.memory_space<vmem>>, vector<1x256xf32>
    %21 = vector.broadcast %20 : vector<1x256xf32> to vector<8x256xf32>
    %22 = arith.mulf %19, %21 : vector<8x256xf32>
    %c24 = arith.constant 24 : index
    %c0_12 = arith.constant 0 : index
    %23 = vector.load %arg6[%c24, %c0_12] : memref<256x256xf32, #tpu.memory_space<vmem>>, vector<8x256xf32>
    tpu.vector_store %arg6[%c24, %c0_12], %22 {strides = array<i32>} : memref<256x256xf32, #tpu.memory_space<vmem>>, vector<8x256xf32>,
    %c64_i32 = arith.constant 64 : i32
    %24 = tpu.dynamic_rotate %3 by %c64_i32 dim 1 : vector<8x256xf32>, i32 -> vector<8x256xf32>
    %c4 = arith.constant 4 : index
    %c0_13 = arith.constant 0 : index
    %25 = vector.load %arg4[%c4, %c0_13] : memref<27x256xf32, #tpu.memory_space<vmem>>, vector<1x256xf32>
    %26 = vector.broadcast %25 : vector<1x256xf32> to vector<8x256xf32>
    %27 = arith.mulf %24, %26 : vector<8x256xf32>
    %c32 = arith.constant 32 : index
    %c0_14 = arith.constant 0 : index
    %28 = vector.load %arg6[%c32, %c0_14] : memref<256x256xf32, #tpu.memory_space<vmem>>, vector<8x256xf32>
    tpu.vector_store %arg6[%c32, %c0_14], %27 {strides = array<i32>} : memref<256x256xf32, #tpu.memory_space<vmem>>, vector<8x256xf32>,
    %c63_i32 = arith.constant 63 : i32
    %29 = tpu.dynamic_rotate %3 by %c63_i32 dim 1 : vector<8x256xf32>, i32 -> vector<8x256xf32>
    %c5 = arith.constant 5 : index
    %c0_15 = arith.constant 0 : index
    %30 = vector.load %arg4[%c5, %c0_15] : memref<27x256xf32, #tpu.memory_space<vmem>>, vector<1x256xf32>
    %31 = vector.broadcast %30 : vector<1x256xf32> to vector<8x256xf32>
    %32 = arith.mulf %29, %31 : vector<8x256xf32>
    %c40 = arith.constant 40 : index
    %c0_16 = arith.constant 0 : index
    %33 = vector.load %arg6[%c40, %c0_16] : memref<256x256xf32, #tpu.memory_space<vmem>>, vector<8x256xf32>
    tpu.vector_store %arg6[%c40, %c0_16], %32 {strides = array<i32>} : memref<256x256xf32, #tpu.memory_space<vmem>>, vector<8x256xf32>,
    %c57_i32 = arith.constant 57 : i32
    %34 = tpu.dynamic_rotate %3 by %c57_i32 dim 1 : vector<8x256xf32>, i32 -> vector<8x256xf32>
    %c6 = arith.constant 6 : index
    %c0_17 = arith.constant 0 : index
    %35 = vector.load %arg4[%c6, %c0_17] : memref<27x256xf32, #tpu.memory_space<vmem>>, vector<1x256xf32>
    %36 = vector.broadcast %35 : vector<1x256xf32> to vector<8x256xf32>
    %37 = arith.mulf %34, %36 : vector<8x256xf32>
    %c48 = arith.constant 48 : index
    %c0_18 = arith.constant 0 : index
    %38 = vector.load %arg6[%c48, %c0_18] : memref<256x256xf32, #tpu.memory_space<vmem>>, vector<8x256xf32>
    tpu.vector_store %arg6[%c48, %c0_18], %37 {strides = array<i32>} : memref<256x256xf32, #tpu.memory_space<vmem>>, vector<8x256xf32>,
    %c56_i32 = arith.constant 56 : i32
    %39 = tpu.dynamic_rotate %3 by %c56_i32 dim 1 : vector<8x256xf32>, i32 -> vector<8x256xf32>
    %c7 = arith.constant 7 : index
    %c0_19 = arith.constant 0 : index
    %40 = vector.load %arg4[%c7, %c0_19] : memref<27x256xf32, #tpu.memory_space<vmem>>, vector<1x256xf32>
    %41 = vector.broadcast %40 : vector<1x256xf32> to vector<8x256xf32>
    %42 = arith.mulf %39, %41 : vector<8x256xf32>
    %c56 = arith.constant 56 : index
    %c0_20 = arith.constant 0 : index
    %43 = vector.load %arg6[%c56, %c0_20] : memref<256x256xf32, #tpu.memory_space<vmem>>, vector<8x256xf32>
    tpu.vector_store %arg6[%c56, %c0_20], %42 {strides = array<i32>} : memref<256x256xf32, #tpu.memory_space<vmem>>, vector<8x256xf32>,
    %c55_i32 = arith.constant 55 : i32
    %44 = tpu.dynamic_rotate %3 by %c55_i32 dim 1 : vector<8x256xf32>, i32 -> vector<8x256xf32>
    %c8_21 = arith.constant 8 : index
    %c0_22 = arith.constant 0 : index
    %45 = vector.load %arg4[%c8_21, %c0_22] : memref<27x256xf32, #tpu.memory_space<vmem>>, vector<1x256xf32>
    %46 = vector.broadcast %45 : vector<1x256xf32> to vector<8x256xf32>
    %47 = arith.mulf %44, %46 : vector<8x256xf32>
    %c64 = arith.constant 64 : index
    %c0_23 = arith.constant 0 : index
    %48 = vector.load %arg6[%c64, %c0_23] : memref<256x256xf32, #tpu.memory_space<vmem>>, vector<8x256xf32>
    tpu.vector_store %arg6[%c64, %c0_23], %47 {strides = array<i32>} : memref<256x256xf32, #tpu.memory_space<vmem>>, vector<8x256xf32>,
    %c9_i32 = arith.constant 9 : i32
    %49 = tpu.dynamic_rotate %3 by %c9_i32 dim 1 : vector<8x256xf32>, i32 -> vector<8x256xf32>
    %c9 = arith.constant 9 : index
    %c0_24 = arith.constant 0 : index
    %50 = vector.load %arg4[%c9, %c0_24] : memref<27x256xf32, #tpu.memory_space<vmem>>, vector<1x256xf32>
    %51 = vector.broadcast %50 : vector<1x256xf32> to vector<8x256xf32>
    %52 = arith.mulf %49, %51 : vector<8x256xf32>
    %c72 = arith.constant 72 : index
    %c0_25 = arith.constant 0 : index
    %53 = vector.load %arg6[%c72, %c0_25] : memref<256x256xf32, #tpu.memory_space<vmem>>, vector<8x256xf32>
    tpu.vector_store %arg6[%c72, %c0_25], %52 {strides = array<i32>} : memref<256x256xf32, #tpu.memory_space<vmem>>, vector<8x256xf32>,
    %c8_i32 = arith.constant 8 : i32
    %54 = tpu.dynamic_rotate %3 by %c8_i32 dim 1 : vector<8x256xf32>, i32 -> vector<8x256xf32>
    %c10 = arith.constant 10 : index
    %c0_26 = arith.constant 0 : index
    %55 = vector.load %arg4[%c10, %c0_26] : memref<27x256xf32, #tpu.memory_space<vmem>>, vector<1x256xf32>
    %56 = vector.broadcast %55 : vector<1x256xf32> to vector<8x256xf32>
    %57 = arith.mulf %54, %56 : vector<8x256xf32>
    %c80 = arith.constant 80 : index
    %c0_27 = arith.constant 0 : index
    %58 = vector.load %arg6[%c80, %c0_27] : memref<256x256xf32, #tpu.memory_space<vmem>>, vector<8x256xf32>
    tpu.vector_store %arg6[%c80, %c0_27], %57 {strides = array<i32>} : memref<256x256xf32, #tpu.memory_space<vmem>>, vector<8x256xf32>,
    %c7_i32 = arith.constant 7 : i32
    %59 = tpu.dynamic_rotate %3 by %c7_i32 dim 1 : vector<8x256xf32>, i32 -> vector<8x256xf32>
    %c11 = arith.constant 11 : index
    %c0_28 = arith.constant 0 : index
    %60 = vector.load %arg4[%c11, %c0_28] : memref<27x256xf32, #tpu.memory_space<vmem>>, vector<1x256xf32>
    %61 = vector.broadcast %60 : vector<1x256xf32> to vector<8x256xf32>
    %62 = arith.mulf %59, %61 : vector<8x256xf32>
    %c88 = arith.constant 88 : index
    %c0_29 = arith.constant 0 : index
    %63 = vector.load %arg6[%c88, %c0_29] : memref<256x256xf32, #tpu.memory_space<vmem>>, vector<8x256xf32>
    tpu.vector_store %arg6[%c88, %c0_29], %62 {strides = array<i32>} : memref<256x256xf32, #tpu.memory_space<vmem>>, vector<8x256xf32>,
    %c1_i32 = arith.constant 1 : i32
    %64 = tpu.dynamic_rotate %3 by %c1_i32 dim 1 : vector<8x256xf32>, i32 -> vector<8x256xf32>
    %c12 = arith.constant 12 : index
    %c0_30 = arith.constant 0 : index
    %65 = vector.load %arg4[%c12, %c0_30] : memref<27x256xf32, #tpu.memory_space<vmem>>, vector<1x256xf32>
    %66 = vector.broadcast %65 : vector<1x256xf32> to vector<8x256xf32>
    %67 = arith.mulf %64, %66 : vector<8x256xf32>
    %c96 = arith.constant 96 : index
    %c0_31 = arith.constant 0 : index
    %68 = vector.load %arg6[%c96, %c0_31] : memref<256x256xf32, #tpu.memory_space<vmem>>, vector<8x256xf32>
    tpu.vector_store %arg6[%c96, %c0_31], %67 {strides = array<i32>} : memref<256x256xf32, #tpu.memory_space<vmem>>, vector<8x256xf32>,
    %c104 = arith.constant 104 : index
    %c0_32 = arith.constant 0 : index
    %69 = vector.load %arg6[%c104, %c0_32] : memref<256x256xf32, #tpu.memory_space<vmem>>, vector<8x256xf32>
    tpu.vector_store %arg6[%c104, %c0_32], %3 {strides = array<i32>} : memref<256x256xf32, #tpu.memory_space<vmem>>, vector<8x256xf32>,
    %c255_i32 = arith.constant 255 : i32
    %70 = tpu.dynamic_rotate %3 by %c255_i32 dim 1 : vector<8x256xf32>, i32 -> vector<8x256xf32>
    %c14 = arith.constant 14 : index
    %c0_33 = arith.constant 0 : index
    %71 = vector.load %arg4[%c14, %c0_33] : memref<27x256xf32, #tpu.memory_space<vmem>>, vector<1x256xf32>
    %72 = vector.broadcast %71 : vector<1x256xf32> to vector<8x256xf32>
    %73 = arith.mulf %70, %72 : vector<8x256xf32>
    %c112 = arith.constant 112 : index
    %c0_34 = arith.constant 0 : index
    %74 = vector.load %arg6[%c112, %c0_34] : memref<256x256xf32, #tpu.memory_space<vmem>>, vector<8x256xf32>
    tpu.vector_store %arg6[%c112, %c0_34], %73 {strides = array<i32>} : memref<256x256xf32, #tpu.memory_space<vmem>>, vector<8x256xf32>,
    %c249_i32 = arith.constant 249 : i32
    %75 = tpu.dynamic_rotate %3 by %c249_i32 dim 1 : vector<8x256xf32>, i32 -> vector<8x256xf32>
    %c15 = arith.constant 15 : index
    %c0_35 = arith.constant 0 : index
    %76 = vector.load %arg4[%c15, %c0_35] : memref<27x256xf32, #tpu.memory_space<vmem>>, vector<1x256xf32>
    %77 = vector.broadcast %76 : vector<1x256xf32> to vector<8x256xf32>
    %78 = arith.mulf %75, %77 : vector<8x256xf32>
    %c120 = arith.constant 120 : index
    %c0_36 = arith.constant 0 : index
    %79 = vector.load %arg6[%c120, %c0_36] : memref<256x256xf32, #tpu.memory_space<vmem>>, vector<8x256xf32>
    tpu.vector_store %arg6[%c120, %c0_36], %78 {strides = array<i32>} : memref<256x256xf32, #tpu.memory_space<vmem>>, vector<8x256xf32>,
    %c248_i32 = arith.constant 248 : i32
    %80 = tpu.dynamic_rotate %3 by %c248_i32 dim 1 : vector<8x256xf32>, i32 -> vector<8x256xf32>
    %c16_37 = arith.constant 16 : index
    %c0_38 = arith.constant 0 : index
    %81 = vector.load %arg4[%c16_37, %c0_38] : memref<27x256xf32, #tpu.memory_space<vmem>>, vector<1x256xf32>
    %82 = vector.broadcast %81 : vector<1x256xf32> to vector<8x256xf32>
    %83 = arith.mulf %80, %82 : vector<8x256xf32>
    %c128 = arith.constant 128 : index
    %c0_39 = arith.constant 0 : index
    %84 = vector.load %arg6[%c128, %c0_39] : memref<256x256xf32, #tpu.memory_space<vmem>>, vector<8x256xf32>
    tpu.vector_store %arg6[%c128, %c0_39], %83 {strides = array<i32>} : memref<256x256xf32, #tpu.memory_space<vmem>>, vector<8x256xf32>,
    %c247_i32 = arith.constant 247 : i32
    %85 = tpu.dynamic_rotate %3 by %c247_i32 dim 1 : vector<8x256xf32>, i32 -> vector<8x256xf32>
    %c17 = arith.constant 17 : index
    %c0_40 = arith.constant 0 : index
    %86 = vector.load %arg4[%c17, %c0_40] : memref<27x256xf32, #tpu.memory_space<vmem>>, vector<1x256xf32>
    %87 = vector.broadcast %86 : vector<1x256xf32> to vector<8x256xf32>
    %88 = arith.mulf %85, %87 : vector<8x256xf32>
    %c136 = arith.constant 136 : index
    %c0_41 = arith.constant 0 : index
    %89 = vector.load %arg6[%c136, %c0_41] : memref<256x256xf32, #tpu.memory_space<vmem>>, vector<8x256xf32>
    tpu.vector_store %arg6[%c136, %c0_41], %88 {strides = array<i32>} : memref<256x256xf32, #tpu.memory_space<vmem>>, vector<8x256xf32>,
    %c201_i32 = arith.constant 201 : i32
    %90 = tpu.dynamic_rotate %3 by %c201_i32 dim 1 : vector<8x256xf32>, i32 -> vector<8x256xf32>
    %c18 = arith.constant 18 : index
    %c0_42 = arith.constant 0 : index
    %91 = vector.load %arg4[%c18, %c0_42] : memref<27x256xf32, #tpu.memory_space<vmem>>, vector<1x256xf32>
    %92 = vector.broadcast %91 : vector<1x256xf32> to vector<8x256xf32>
    %93 = arith.mulf %90, %92 : vector<8x256xf32>
    %c144 = arith.constant 144 : index
    %c0_43 = arith.constant 0 : index
    %94 = vector.load %arg6[%c144, %c0_43] : memref<256x256xf32, #tpu.memory_space<vmem>>, vector<8x256xf32>
    tpu.vector_store %arg6[%c144, %c0_43], %93 {strides = array<i32>} : memref<256x256xf32, #tpu.memory_space<vmem>>, vector<8x256xf32>,
    %c200_i32 = arith.constant 200 : i32
    %95 = tpu.dynamic_rotate %3 by %c200_i32 dim 1 : vector<8x256xf32>, i32 -> vector<8x256xf32>
    %c19 = arith.constant 19 : index
    %c0_44 = arith.constant 0 : index
    %96 = vector.load %arg4[%c19, %c0_44] : memref<27x256xf32, #tpu.memory_space<vmem>>, vector<1x256xf32>
    %97 = vector.broadcast %96 : vector<1x256xf32> to vector<8x256xf32>
    %98 = arith.mulf %95, %97 : vector<8x256xf32>
    %c152 = arith.constant 152 : index
    %c0_45 = arith.constant 0 : index
    %99 = vector.load %arg6[%c152, %c0_45] : memref<256x256xf32, #tpu.memory_space<vmem>>, vector<8x256xf32>
    tpu.vector_store %arg6[%c152, %c0_45], %98 {strides = array<i32>} : memref<256x256xf32, #tpu.memory_space<vmem>>, vector<8x256xf32>,
    %c199_i32 = arith.constant 199 : i32
    %100 = tpu.dynamic_rotate %3 by %c199_i32 dim 1 : vector<8x256xf32>, i32 -> vector<8x256xf32>
    %c20 = arith.constant 20 : index
    %c0_46 = arith.constant 0 : index
    %101 = vector.load %arg4[%c20, %c0_46] : memref<27x256xf32, #tpu.memory_space<vmem>>, vector<1x256xf32>
    %102 = vector.broadcast %101 : vector<1x256xf32> to vector<8x256xf32>
    %103 = arith.mulf %100, %102 : vector<8x256xf32>
    %c160 = arith.constant 160 : index
    %c0_47 = arith.constant 0 : index
    %104 = vector.load %arg6[%c160, %c0_47] : memref<256x256xf32, #tpu.memory_space<vmem>>, vector<8x256xf32>
    tpu.vector_store %arg6[%c160, %c0_47], %103 {strides = array<i32>} : memref<256x256xf32, #tpu.memory_space<vmem>>, vector<8x256xf32>,
    %c193_i32 = arith.constant 193 : i32
    %105 = tpu.dynamic_rotate %3 by %c193_i32 dim 1 : vector<8x256xf32>, i32 -> vector<8x256xf32>
    %c21 = arith.constant 21 : index
    %c0_48 = arith.constant 0 : index
    %106 = vector.load %arg4[%c21, %c0_48] : memref<27x256xf32, #tpu.memory_space<vmem>>, vector<1x256xf32>
    %107 = vector.broadcast %106 : vector<1x256xf32> to vector<8x256xf32>
    %108 = arith.mulf %105, %107 : vector<8x256xf32>
    %c168 = arith.constant 168 : index
    %c0_49 = arith.constant 0 : index
    %109 = vector.load %arg6[%c168, %c0_49] : memref<256x256xf32, #tpu.memory_space<vmem>>, vector<8x256xf32>
    tpu.vector_store %arg6[%c168, %c0_49], %108 {strides = array<i32>} : memref<256x256xf32, #tpu.memory_space<vmem>>, vector<8x256xf32>,
    %c192_i32 = arith.constant 192 : i32
    %110 = tpu.dynamic_rotate %3 by %c192_i32 dim 1 : vector<8x256xf32>, i32 -> vector<8x256xf32>
    %c22 = arith.constant 22 : index
    %c0_50 = arith.constant 0 : index
    %111 = vector.load %arg4[%c22, %c0_50] : memref<27x256xf32, #tpu.memory_space<vmem>>, vector<1x256xf32>
    %112 = vector.broadcast %111 : vector<1x256xf32> to vector<8x256xf32>
    %113 = arith.mulf %110, %112 : vector<8x256xf32>
    %c176 = arith.constant 176 : index
    %c0_51 = arith.constant 0 : index
    %114 = vector.load %arg6[%c176, %c0_51] : memref<256x256xf32, #tpu.memory_space<vmem>>, vector<8x256xf32>
    tpu.vector_store %arg6[%c176, %c0_51], %113 {strides = array<i32>} : memref<256x256xf32, #tpu.memory_space<vmem>>, vector<8x256xf32>,
    %c191_i32 = arith.constant 191 : i32
    %115 = tpu.dynamic_rotate %3 by %c191_i32 dim 1 : vector<8x256xf32>, i32 -> vector<8x256xf32>
    %c23 = arith.constant 23 : index
    %c0_52 = arith.constant 0 : index
    %116 = vector.load %arg4[%c23, %c0_52] : memref<27x256xf32, #tpu.memory_space<vmem>>, vector<1x256xf32>
    %117 = vector.broadcast %116 : vector<1x256xf32> to vector<8x256xf32>
    %118 = arith.mulf %115, %117 : vector<8x256xf32>
    %c184 = arith.constant 184 : index
    %c0_53 = arith.constant 0 : index
    %119 = vector.load %arg6[%c184, %c0_53] : memref<256x256xf32, #tpu.memory_space<vmem>>, vector<8x256xf32>
    tpu.vector_store %arg6[%c184, %c0_53], %118 {strides = array<i32>} : memref<256x256xf32, #tpu.memory_space<vmem>>, vector<8x256xf32>,
    %c185_i32 = arith.constant 185 : i32
    %120 = tpu.dynamic_rotate %3 by %c185_i32 dim 1 : vector<8x256xf32>, i32 -> vector<8x256xf32>
    %c24_54 = arith.constant 24 : index
    %c0_55 = arith.constant 0 : index
    %121 = vector.load %arg4[%c24_54, %c0_55] : memref<27x256xf32, #tpu.memory_space<vmem>>, vector<1x256xf32>
    %122 = vector.broadcast %121 : vector<1x256xf32> to vector<8x256xf32>
    %123 = arith.mulf %120, %122 : vector<8x256xf32>
    %c192 = arith.constant 192 : index
    %c0_56 = arith.constant 0 : index
    %124 = vector.load %arg6[%c192, %c0_56] : memref<256x256xf32, #tpu.memory_space<vmem>>, vector<8x256xf32>
    tpu.vector_store %arg6[%c192, %c0_56], %123 {strides = array<i32>} : memref<256x256xf32, #tpu.memory_space<vmem>>, vector<8x256xf32>,
    %c184_i32 = arith.constant 184 : i32
    %125 = tpu.dynamic_rotate %3 by %c184_i32 dim 1 : vector<8x256xf32>, i32 -> vector<8x256xf32>
    %c25 = arith.constant 25 : index
    %c0_57 = arith.constant 0 : index
    %126 = vector.load %arg4[%c25, %c0_57] : memref<27x256xf32, #tpu.memory_space<vmem>>, vector<1x256xf32>
    %127 = vector.broadcast %126 : vector<1x256xf32> to vector<8x256xf32>
    %128 = arith.mulf %125, %127 : vector<8x256xf32>
    %c200 = arith.constant 200 : index
    %c0_58 = arith.constant 0 : index
    %129 = vector.load %arg6[%c200, %c0_58] : memref<256x256xf32, #tpu.memory_space<vmem>>, vector<8x256xf32>
    tpu.vector_store %arg6[%c200, %c0_58], %128 {strides = array<i32>} : memref<256x256xf32, #tpu.memory_space<vmem>>, vector<8x256xf32>,
    %c183_i32 = arith.constant 183 : i32
    %130 = tpu.dynamic_rotate %3 by %c183_i32 dim 1 : vector<8x256xf32>, i32 -> vector<8x256xf32>
    %c26 = arith.constant 26 : index
    %c0_59 = arith.constant 0 : index
    %131 = vector.load %arg4[%c26, %c0_59] : memref<27x256xf32, #tpu.memory_space<vmem>>, vector<1x256xf32>
    %132 = vector.broadcast %131 : vector<1x256xf32> to vector<8x256xf32>
    %133 = arith.mulf %130, %132 : vector<8x256xf32>
    %c208 = arith.constant 208 : index
    %c0_60 = arith.constant 0 : index
    %134 = vector.load %arg6[%c208, %c0_60] : memref<256x256xf32, #tpu.memory_space<vmem>>, vector<8x256xf32>
    tpu.vector_store %arg6[%c208, %c0_60], %133 {strides = array<i32>} : memref<256x256xf32, #tpu.memory_space<vmem>>, vector<8x256xf32>,
    %c0_61 = arith.constant 0 : index
    %c0_62 = arith.constant 0 : index
    %135 = vector.load %arg2[%c0_61, %c0_62] : memref<16x256xf32, #tpu.memory_space<vmem>>, vector<16x256xf32>
    %c0_63 = arith.constant 0 : index
    %c0_64 = arith.constant 0 : index
    %136 = vector.load %arg6[%c0_63, %c0_64] : memref<256x256xf32, #tpu.memory_space<vmem>>, vector<256x256xf32>
    %cst_65 = arith.constant dense<0.000000e+00> : vector<16x256xf32>
    %137 = tpu.matmul %135, %136, %cst_65 {dimension_numbers = #tpu.dot_dimension_numbers<[1], [0], [0], [1], [0, 0, 1, 1], [], []>} : vector<16x256xf32>, vector<256x256xf32>, vector<16x256xf32> -> vector<16x256xf32>
    %138 = vector.extract_strided_slice %137 {offsets = [8, 0], sizes = [8, 256], strides = [1, 1]} : vector<16x256xf32> to vector<8x256xf32>
    %cst_66 = arith.constant dense<0.000000e+00> : vector<8xf32>
    %139 = vector.multi_reduction <add>, %138, %cst_66 [1] : vector<8x256xf32> to vector<8xf32>
    %140 = vector.shape_cast %139 : vector<8xf32> to vector<8x1xf32>
    %cst_67 = arith.constant 3.906250e-03 : f32
    %141 = vector.broadcast %cst_67 : f32 to vector<8x1xf32>
    %142 = arith.mulf %140, %141 : vector<8x1xf32>
    %143 = arith.mulf %138, %138 : vector<8x256xf32>
    %cst_68 = arith.constant dense<0.000000e+00> : vector<8xf32>
    %144 = vector.multi_reduction <add>, %143, %cst_68 [1] : vector<8x256xf32> to vector<8xf32>
    %145 = vector.shape_cast %144 : vector<8xf32> to vector<8x1xf32>
    %cst_69 = arith.constant 3.906250e-03 : f32
    %146 = vector.broadcast %cst_69 : f32 to vector<8x1xf32>
    %147 = arith.mulf %145, %146 : vector<8x1xf32>
    %148 = arith.mulf %142, %142 : vector<8x1xf32>
    %149 = arith.subf %147, %148 : vector<8x1xf32>
    %cst_70 = arith.constant 0.000000e+00 : f32
    %150 = vector.broadcast %cst_70 : f32 to vector<8x1xf32>
    %151 = arith.maximumf %149, %150 : vector<8x1xf32>
    %152 = vector.broadcast %142 : vector<8x1xf32> to vector<8x256xf32>
    %153 = arith.subf %138, %152 : vector<8x256xf32>
    %cst_71 = arith.constant 9.99999974E-6 : f32
    %154 = vector.broadcast %cst_71 : f32 to vector<8x1xf32>
    %155 = arith.addf %151, %154 : vector<8x1xf32>
    %156 = math.rsqrt %155 : vector<8x1xf32>
    %157 = vector.broadcast %156 : vector<8x1xf32> to vector<8x256xf32>
    %158 = arith.mulf %153, %157 : vector<8x256xf32>
    %159 = vector.extract_strided_slice %137 {offsets = [0, 0], sizes = [8, 256], strides = [1, 1]} : vector<16x256xf32> to vector<8x256xf32>
    %cst_72 = arith.constant dense<0.000000e+00> : vector<8xf32>
    %160 = vector.multi_reduction <add>, %159, %cst_72 [1] : vector<8x256xf32> to vector<8xf32>
    %161 = vector.shape_cast %160 : vector<8xf32> to vector<8x1xf32>
    %cst_73 = arith.constant 3.906250e-03 : f32
    %162 = vector.broadcast %cst_73 : f32 to vector<8x1xf32>
    %163 = arith.mulf %161, %162 : vector<8x1xf32>
    %164 = arith.mulf %159, %159 : vector<8x256xf32>
    %cst_74 = arith.constant dense<0.000000e+00> : vector<8xf32>
    %165 = vector.multi_reduction <add>, %164, %cst_74 [1] : vector<8x256xf32> to vector<8xf32>
    %166 = vector.shape_cast %165 : vector<8xf32> to vector<8x1xf32>
    %cst_75 = arith.constant 3.906250e-03 : f32
    %167 = vector.broadcast %cst_75 : f32 to vector<8x1xf32>
    %168 = arith.mulf %166, %167 : vector<8x1xf32>
    %169 = arith.mulf %163, %163 : vector<8x1xf32>
    %170 = arith.subf %168, %169 : vector<8x1xf32>
    %cst_76 = arith.constant 0.000000e+00 : f32
    %171 = vector.broadcast %cst_76 : f32 to vector<8x1xf32>
    %172 = arith.maximumf %170, %171 : vector<8x1xf32>
    %173 = vector.broadcast %163 : vector<8x1xf32> to vector<8x256xf32>
    %174 = arith.subf %159, %173 : vector<8x256xf32>
    %cst_77 = arith.constant 9.99999974E-6 : f32
    %175 = vector.broadcast %cst_77 : f32 to vector<8x1xf32>
    %176 = arith.addf %172, %175 : vector<8x1xf32>
    %177 = math.rsqrt %176 : vector<8x1xf32>
    %178 = vector.broadcast %177 : vector<8x1xf32> to vector<8x256xf32>
    %179 = arith.mulf %174, %178 : vector<8x256xf32>
    %cst_78 = arith.constant 0.000000e+00 : f32
    %180 = vector.broadcast %cst_78 : f32 to vector<8x256xf32>
    %181 = arith.cmpf oge, %179, %180 : vector<8x256xf32>
    %cst_79 = arith.constant 0.00999999977 : f32
    %182 = vector.broadcast %cst_79 : f32 to vector<8x256xf32>
    %183 = arith.mulf %179, %182 : vector<8x256xf32>
    %184 = arith.select %181, %179, %183 : vector<8x256xi1>, vector<8x256xf32>
    %185 = arith.addf %184, %158 : vector<8x256xf32>
    %cst_80 = arith.constant 0.000000e+00 : f32
    %186 = vector.broadcast %cst_80 : f32 to vector<8x256xf32>
    %187 = arith.cmpf oge, %185, %186 : vector<8x256xf32>
    %cst_81 = arith.constant 0.00999999977 : f32
    %188 = vector.broadcast %cst_81 : f32 to vector<8x256xf32>
    %189 = arith.mulf %185, %188 : vector<8x256xf32>
    %190 = arith.select %187, %185, %189 : vector<8x256xi1>, vector<8x256xf32>
    %cst_82 = arith.constant dense<0.000000e+00> : vector<8xf32>
    %191 = vector.multi_reduction <add>, %190, %cst_82 [1] : vector<8x256xf32> to vector<8xf32>
    %192 = vector.shape_cast %191 : vector<8xf32> to vector<8x1xf32>
    %cst_83 = arith.constant 3.906250e-03 : f32
    %193 = vector.broadcast %cst_83 : f32 to vector<8x1xf32>
    %194 = arith.mulf %192, %193 : vector<8x1xf32>
    %195 = arith.mulf %190, %190 : vector<8x256xf32>
    %cst_84 = arith.constant dense<0.000000e+00> : vector<8xf32>
    %196 = vector.multi_reduction <add>, %195, %cst_84 [1] : vector<8x256xf32> to vector<8xf32>
    %197 = vector.shape_cast %196 : vector<8xf32> to vector<8x1xf32>
    %cst_85 = arith.constant 3.906250e-03 : f32
    %198 = vector.broadcast %cst_85 : f32 to vector<8x1xf32>
    %199 = arith.mulf %197, %198 : vector<8x1xf32>
    %200 = arith.mulf %194, %194 : vector<8x1xf32>
    %201 = arith.subf %199, %200 : vector<8x1xf32>
    %cst_86 = arith.constant 0.000000e+00 : f32
    %202 = vector.broadcast %cst_86 : f32 to vector<8x1xf32>
    %203 = arith.maximumf %201, %202 : vector<8x1xf32>
    %204 = vector.broadcast %194 : vector<8x1xf32> to vector<8x256xf32>
    %205 = arith.subf %190, %204 : vector<8x256xf32>
    %cst_87 = arith.constant 9.99999974E-6 : f32
    %206 = vector.broadcast %cst_87 : f32 to vector<8x1xf32>
    %207 = arith.addf %203, %206 : vector<8x1xf32>
    %208 = math.rsqrt %207 : vector<8x1xf32>
    %209 = vector.broadcast %208 : vector<8x1xf32> to vector<8x256xf32>
    %210 = arith.mulf %205, %209 : vector<8x256xf32>
    %c73_i32_88 = arith.constant 73 : i32
    %211 = tpu.dynamic_rotate %210 by %c73_i32_88 dim 1 : vector<8x256xf32>, i32 -> vector<8x256xf32>
    %c0_89 = arith.constant 0 : index
    %c0_90 = arith.constant 0 : index
    %212 = vector.load %arg4[%c0_89, %c0_90] : memref<27x256xf32, #tpu.memory_space<vmem>>, vector<1x256xf32>
    %213 = vector.broadcast %212 : vector<1x256xf32> to vector<8x256xf32>
    %214 = arith.mulf %211, %213 : vector<8x256xf32>
    %c0_91 = arith.constant 0 : index
    %c0_92 = arith.constant 0 : index
    %215 = vector.load %arg6[%c0_91, %c0_92] : memref<256x256xf32, #tpu.memory_space<vmem>>, vector<8x256xf32>
    tpu.vector_store %arg6[%c0_91, %c0_92], %214 {strides = array<i32>} : memref<256x256xf32, #tpu.memory_space<vmem>>, vector<8x256xf32>,
    %c72_i32_93 = arith.constant 72 : i32
    %216 = tpu.dynamic_rotate %210 by %c72_i32_93 dim 1 : vector<8x256xf32>, i32 -> vector<8x256xf32>
    %c1_94 = arith.constant 1 : index
    %c0_95 = arith.constant 0 : index
    %217 = vector.load %arg4[%c1_94, %c0_95] : memref<27x256xf32, #tpu.memory_space<vmem>>, vector<1x256xf32>
    %218 = vector.broadcast %217 : vector<1x256xf32> to vector<8x256xf32>
    %219 = arith.mulf %216, %218 : vector<8x256xf32>
    %c8_96 = arith.constant 8 : index
    %c0_97 = arith.constant 0 : index
    %220 = vector.load %arg6[%c8_96, %c0_97] : memref<256x256xf32, #tpu.memory_space<vmem>>, vector<8x256xf32>
    tpu.vector_store %arg6[%c8_96, %c0_97], %219 {strides = array<i32>} : memref<256x256xf32, #tpu.memory_space<vmem>>, vector<8x256xf32>,
    %c71_i32_98 = arith.constant 71 : i32
    %221 = tpu.dynamic_rotate %210 by %c71_i32_98 dim 1 : vector<8x256xf32>, i32 -> vector<8x256xf32>
    %c2_99 = arith.constant 2 : index
    %c0_100 = arith.constant 0 : index
    %222 = vector.load %arg4[%c2_99, %c0_100] : memref<27x256xf32, #tpu.memory_space<vmem>>, vector<1x256xf32>
    %223 = vector.broadcast %222 : vector<1x256xf32> to vector<8x256xf32>
    %224 = arith.mulf %221, %223 : vector<8x256xf32>
    %c16_101 = arith.constant 16 : index
    %c0_102 = arith.constant 0 : index
    %225 = vector.load %arg6[%c16_101, %c0_102] : memref<256x256xf32, #tpu.memory_space<vmem>>, vector<8x256xf32>
    tpu.vector_store %arg6[%c16_101, %c0_102], %224 {strides = array<i32>} : memref<256x256xf32, #tpu.memory_space<vmem>>, vector<8x256xf32>,
    %c65_i32_103 = arith.constant 65 : i32
    %226 = tpu.dynamic_rotate %210 by %c65_i32_103 dim 1 : vector<8x256xf32>, i32 -> vector<8x256xf32>
    %c3_104 = arith.constant 3 : index
    %c0_105 = arith.constant 0 : index
    %227 = vector.load %arg4[%c3_104, %c0_105] : memref<27x256xf32, #tpu.memory_space<vmem>>, vector<1x256xf32>
    %228 = vector.broadcast %227 : vector<1x256xf32> to vector<8x256xf32>
    %229 = arith.mulf %226, %228 : vector<8x256xf32>
    %c24_106 = arith.constant 24 : index
    %c0_107 = arith.constant 0 : index
    %230 = vector.load %arg6[%c24_106, %c0_107] : memref<256x256xf32, #tpu.memory_space<vmem>>, vector<8x256xf32>
    tpu.vector_store %arg6[%c24_106, %c0_107], %229 {strides = array<i32>} : memref<256x256xf32, #tpu.memory_space<vmem>>, vector<8x256xf32>,
    %c64_i32_108 = arith.constant 64 : i32
    %231 = tpu.dynamic_rotate %210 by %c64_i32_108 dim 1 : vector<8x256xf32>, i32 -> vector<8x256xf32>
    %c4_109 = arith.constant 4 : index
    %c0_110 = arith.constant 0 : index
    %232 = vector.load %arg4[%c4_109, %c0_110] : memref<27x256xf32, #tpu.memory_space<vmem>>, vector<1x256xf32>
    %233 = vector.broadcast %232 : vector<1x256xf32> to vector<8x256xf32>
    %234 = arith.mulf %231, %233 : vector<8x256xf32>
    %c32_111 = arith.constant 32 : index
    %c0_112 = arith.constant 0 : index
    %235 = vector.load %arg6[%c32_111, %c0_112] : memref<256x256xf32, #tpu.memory_space<vmem>>, vector<8x256xf32>
    tpu.vector_store %arg6[%c32_111, %c0_112], %234 {strides = array<i32>} : memref<256x256xf32, #tpu.memory_space<vmem>>, vector<8x256xf32>,
    %c63_i32_113 = arith.constant 63 : i32
    %236 = tpu.dynamic_rotate %210 by %c63_i32_113 dim 1 : vector<8x256xf32>, i32 -> vector<8x256xf32>
    %c5_114 = arith.constant 5 : index
    %c0_115 = arith.constant 0 : index
    %237 = vector.load %arg4[%c5_114, %c0_115] : memref<27x256xf32, #tpu.memory_space<vmem>>, vector<1x256xf32>
    %238 = vector.broadcast %237 : vector<1x256xf32> to vector<8x256xf32>
    %239 = arith.mulf %236, %238 : vector<8x256xf32>
    %c40_116 = arith.constant 40 : index
    %c0_117 = arith.constant 0 : index
    %240 = vector.load %arg6[%c40_116, %c0_117] : memref<256x256xf32, #tpu.memory_space<vmem>>, vector<8x256xf32>
    tpu.vector_store %arg6[%c40_116, %c0_117], %239 {strides = array<i32>} : memref<256x256xf32, #tpu.memory_space<vmem>>, vector<8x256xf32>,
    %c57_i32_118 = arith.constant 57 : i32
    %241 = tpu.dynamic_rotate %210 by %c57_i32_118 dim 1 : vector<8x256xf32>, i32 -> vector<8x256xf32>
    %c6_119 = arith.constant 6 : index
    %c0_120 = arith.constant 0 : index
    %242 = vector.load %arg4[%c6_119, %c0_120] : memref<27x256xf32, #tpu.memory_space<vmem>>, vector<1x256xf32>
    %243 = vector.broadcast %242 : vector<1x256xf32> to vector<8x256xf32>
    %244 = arith.mulf %241, %243 : vector<8x256xf32>
    %c48_121 = arith.constant 48 : index
    %c0_122 = arith.constant 0 : index
    %245 = vector.load %arg6[%c48_121, %c0_122] : memref<256x256xf32, #tpu.memory_space<vmem>>, vector<8x256xf32>
    tpu.vector_store %arg6[%c48_121, %c0_122], %244 {strides = array<i32>} : memref<256x256xf32, #tpu.memory_space<vmem>>, vector<8x256xf32>,
    %c56_i32_123 = arith.constant 56 : i32
    %246 = tpu.dynamic_rotate %210 by %c56_i32_123 dim 1 : vector<8x256xf32>, i32 -> vector<8x256xf32>
    %c7_124 = arith.constant 7 : index
    %c0_125 = arith.constant 0 : index
    %247 = vector.load %arg4[%c7_124, %c0_125] : memref<27x256xf32, #tpu.memory_space<vmem>>, vector<1x256xf32>
    %248 = vector.broadcast %247 : vector<1x256xf32> to vector<8x256xf32>
    %249 = arith.mulf %246, %248 : vector<8x256xf32>
    %c56_126 = arith.constant 56 : index
    %c0_127 = arith.constant 0 : index
    %250 = vector.load %arg6[%c56_126, %c0_127] : memref<256x256xf32, #tpu.memory_space<vmem>>, vector<8x256xf32>
    tpu.vector_store %arg6[%c56_126, %c0_127], %249 {strides = array<i32>} : memref<256x256xf32, #tpu.memory_space<vmem>>, vector<8x256xf32>,
    %c55_i32_128 = arith.constant 55 : i32
    %251 = tpu.dynamic_rotate %210 by %c55_i32_128 dim 1 : vector<8x256xf32>, i32 -> vector<8x256xf32>
    %c8_129 = arith.constant 8 : index
    %c0_130 = arith.constant 0 : index
    %252 = vector.load %arg4[%c8_129, %c0_130] : memref<27x256xf32, #tpu.memory_space<vmem>>, vector<1x256xf32>
    %253 = vector.broadcast %252 : vector<1x256xf32> to vector<8x256xf32>
    %254 = arith.mulf %251, %253 : vector<8x256xf32>
    %c64_131 = arith.constant 64 : index
    %c0_132 = arith.constant 0 : index
    %255 = vector.load %arg6[%c64_131, %c0_132] : memref<256x256xf32, #tpu.memory_space<vmem>>, vector<8x256xf32>
    tpu.vector_store %arg6[%c64_131, %c0_132], %254 {strides = array<i32>} : memref<256x256xf32, #tpu.memory_space<vmem>>, vector<8x256xf32>,
    %c9_i32_133 = arith.constant 9 : i32
    %256 = tpu.dynamic_rotate %210 by %c9_i32_133 dim 1 : vector<8x256xf32>, i32 -> vector<8x256xf32>
    %c9_134 = arith.constant 9 : index
    %c0_135 = arith.constant 0 : index
    %257 = vector.load %arg4[%c9_134, %c0_135] : memref<27x256xf32, #tpu.memory_space<vmem>>, vector<1x256xf32>
    %258 = vector.broadcast %257 : vector<1x256xf32> to vector<8x256xf32>
    %259 = arith.mulf %256, %258 : vector<8x256xf32>
    %c72_136 = arith.constant 72 : index
    %c0_137 = arith.constant 0 : index
    %260 = vector.load %arg6[%c72_136, %c0_137] : memref<256x256xf32, #tpu.memory_space<vmem>>, vector<8x256xf32>
    tpu.vector_store %arg6[%c72_136, %c0_137], %259 {strides = array<i32>} : memref<256x256xf32, #tpu.memory_space<vmem>>, vector<8x256xf32>,
    %c8_i32_138 = arith.constant 8 : i32
    %261 = tpu.dynamic_rotate %210 by %c8_i32_138 dim 1 : vector<8x256xf32>, i32 -> vector<8x256xf32>
    %c10_139 = arith.constant 10 : index
    %c0_140 = arith.constant 0 : index
    %262 = vector.load %arg4[%c10_139, %c0_140] : memref<27x256xf32, #tpu.memory_space<vmem>>, vector<1x256xf32>
    %263 = vector.broadcast %262 : vector<1x256xf32> to vector<8x256xf32>
    %264 = arith.mulf %261, %263 : vector<8x256xf32>
    %c80_141 = arith.constant 80 : index
    %c0_142 = arith.constant 0 : index
    %265 = vector.load %arg6[%c80_141, %c0_142] : memref<256x256xf32, #tpu.memory_space<vmem>>, vector<8x256xf32>
    tpu.vector_store %arg6[%c80_141, %c0_142], %264 {strides = array<i32>} : memref<256x256xf32, #tpu.memory_space<vmem>>, vector<8x256xf32>,
    %c7_i32_143 = arith.constant 7 : i32
    %266 = tpu.dynamic_rotate %210 by %c7_i32_143 dim 1 : vector<8x256xf32>, i32 -> vector<8x256xf32>
    %c11_144 = arith.constant 11 : index
    %c0_145 = arith.constant 0 : index
    %267 = vector.load %arg4[%c11_144, %c0_145] : memref<27x256xf32, #tpu.memory_space<vmem>>, vector<1x256xf32>
    %268 = vector.broadcast %267 : vector<1x256xf32> to vector<8x256xf32>
    %269 = arith.mulf %266, %268 : vector<8x256xf32>
    %c88_146 = arith.constant 88 : index
    %c0_147 = arith.constant 0 : index
    %270 = vector.load %arg6[%c88_146, %c0_147] : memref<256x256xf32, #tpu.memory_space<vmem>>, vector<8x256xf32>
    tpu.vector_store %arg6[%c88_146, %c0_147], %269 {strides = array<i32>} : memref<256x256xf32, #tpu.memory_space<vmem>>, vector<8x256xf32>,
    %c1_i32_148 = arith.constant 1 : i32
    %271 = tpu.dynamic_rotate %210 by %c1_i32_148 dim 1 : vector<8x256xf32>, i32 -> vector<8x256xf32>
    %c12_149 = arith.constant 12 : index
    %c0_150 = arith.constant 0 : index
    %272 = vector.load %arg4[%c12_149, %c0_150] : memref<27x256xf32, #tpu.memory_space<vmem>>, vector<1x256xf32>
    %273 = vector.broadcast %272 : vector<1x256xf32> to vector<8x256xf32>
    %274 = arith.mulf %271, %273 : vector<8x256xf32>
    %c96_151 = arith.constant 96 : index
    %c0_152 = arith.constant 0 : index
    %275 = vector.load %arg6[%c96_151, %c0_152] : memref<256x256xf32, #tpu.memory_space<vmem>>, vector<8x256xf32>
    tpu.vector_store %arg6[%c96_151, %c0_152], %274 {strides = array<i32>} : memref<256x256xf32, #tpu.memory_space<vmem>>, vector<8x256xf32>,
    %c104_153 = arith.constant 104 : index
    %c0_154 = arith.constant 0 : index
    %276 = vector.load %arg6[%c104_153, %c0_154] : memref<256x256xf32, #tpu.memory_space<vmem>>, vector<8x256xf32>
    tpu.vector_store %arg6[%c104_153, %c0_154], %210 {strides = array<i32>} : memref<256x256xf32, #tpu.memory_space<vmem>>, vector<8x256xf32>,
    %c255_i32_155 = arith.constant 255 : i32
    %277 = tpu.dynamic_rotate %210 by %c255_i32_155 dim 1 : vector<8x256xf32>, i32 -> vector<8x256xf32>
    %c14_156 = arith.constant 14 : index
    %c0_157 = arith.constant 0 : index
    %278 = vector.load %arg4[%c14_156, %c0_157] : memref<27x256xf32, #tpu.memory_space<vmem>>, vector<1x256xf32>
    %279 = vector.broadcast %278 : vector<1x256xf32> to vector<8x256xf32>
    %280 = arith.mulf %277, %279 : vector<8x256xf32>
    %c112_158 = arith.constant 112 : index
    %c0_159 = arith.constant 0 : index
    %281 = vector.load %arg6[%c112_158, %c0_159] : memref<256x256xf32, #tpu.memory_space<vmem>>, vector<8x256xf32>
    tpu.vector_store %arg6[%c112_158, %c0_159], %280 {strides = array<i32>} : memref<256x256xf32, #tpu.memory_space<vmem>>, vector<8x256xf32>,
    %c249_i32_160 = arith.constant 249 : i32
    %282 = tpu.dynamic_rotate %210 by %c249_i32_160 dim 1 : vector<8x256xf32>, i32 -> vector<8x256xf32>
    %c15_161 = arith.constant 15 : index
    %c0_162 = arith.constant 0 : index
    %283 = vector.load %arg4[%c15_161, %c0_162] : memref<27x256xf32, #tpu.memory_space<vmem>>, vector<1x256xf32>
    %284 = vector.broadcast %283 : vector<1x256xf32> to vector<8x256xf32>
    %285 = arith.mulf %282, %284 : vector<8x256xf32>
    %c120_163 = arith.constant 120 : index
    %c0_164 = arith.constant 0 : index
    %286 = vector.load %arg6[%c120_163, %c0_164] : memref<256x256xf32, #tpu.memory_space<vmem>>, vector<8x256xf32>
    tpu.vector_store %arg6[%c120_163, %c0_164], %285 {strides = array<i32>} : memref<256x256xf32, #tpu.memory_space<vmem>>, vector<8x256xf32>,
    %c248_i32_165 = arith.constant 248 : i32
    %287 = tpu.dynamic_rotate %210 by %c248_i32_165 dim 1 : vector<8x256xf32>, i32 -> vector<8x256xf32>
    %c16_166 = arith.constant 16 : index
    %c0_167 = arith.constant 0 : index
    %288 = vector.load %arg4[%c16_166, %c0_167] : memref<27x256xf32, #tpu.memory_space<vmem>>, vector<1x256xf32>
    %289 = vector.broadcast %288 : vector<1x256xf32> to vector<8x256xf32>
    %290 = arith.mulf %287, %289 : vector<8x256xf32>
    %c128_168 = arith.constant 128 : index
    %c0_169 = arith.constant 0 : index
    %291 = vector.load %arg6[%c128_168, %c0_169] : memref<256x256xf32, #tpu.memory_space<vmem>>, vector<8x256xf32>
    tpu.vector_store %arg6[%c128_168, %c0_169], %290 {strides = array<i32>} : memref<256x256xf32, #tpu.memory_space<vmem>>, vector<8x256xf32>,
    %c247_i32_170 = arith.constant 247 : i32
    %292 = tpu.dynamic_rotate %210 by %c247_i32_170 dim 1 : vector<8x256xf32>, i32 -> vector<8x256xf32>
    %c17_171 = arith.constant 17 : index
    %c0_172 = arith.constant 0 : index
    %293 = vector.load %arg4[%c17_171, %c0_172] : memref<27x256xf32, #tpu.memory_space<vmem>>, vector<1x256xf32>
    %294 = vector.broadcast %293 : vector<1x256xf32> to vector<8x256xf32>
    %295 = arith.mulf %292, %294 : vector<8x256xf32>
    %c136_173 = arith.constant 136 : index
    %c0_174 = arith.constant 0 : index
    %296 = vector.load %arg6[%c136_173, %c0_174] : memref<256x256xf32, #tpu.memory_space<vmem>>, vector<8x256xf32>
    tpu.vector_store %arg6[%c136_173, %c0_174], %295 {strides = array<i32>} : memref<256x256xf32, #tpu.memory_space<vmem>>, vector<8x256xf32>,
    %c201_i32_175 = arith.constant 201 : i32
    %297 = tpu.dynamic_rotate %210 by %c201_i32_175 dim 1 : vector<8x256xf32>, i32 -> vector<8x256xf32>
    %c18_176 = arith.constant 18 : index
    %c0_177 = arith.constant 0 : index
    %298 = vector.load %arg4[%c18_176, %c0_177] : memref<27x256xf32, #tpu.memory_space<vmem>>, vector<1x256xf32>
    %299 = vector.broadcast %298 : vector<1x256xf32> to vector<8x256xf32>
    %300 = arith.mulf %297, %299 : vector<8x256xf32>
    %c144_178 = arith.constant 144 : index
    %c0_179 = arith.constant 0 : index
    %301 = vector.load %arg6[%c144_178, %c0_179] : memref<256x256xf32, #tpu.memory_space<vmem>>, vector<8x256xf32>
    tpu.vector_store %arg6[%c144_178, %c0_179], %300 {strides = array<i32>} : memref<256x256xf32, #tpu.memory_space<vmem>>, vector<8x256xf32>,
    %c200_i32_180 = arith.constant 200 : i32
    %302 = tpu.dynamic_rotate %210 by %c200_i32_180 dim 1 : vector<8x256xf32>, i32 -> vector<8x256xf32>
    %c19_181 = arith.constant 19 : index
    %c0_182 = arith.constant 0 : index
    %303 = vector.load %arg4[%c19_181, %c0_182] : memref<27x256xf32, #tpu.memory_space<vmem>>, vector<1x256xf32>
    %304 = vector.broadcast %303 : vector<1x256xf32> to vector<8x256xf32>
    %305 = arith.mulf %302, %304 : vector<8x256xf32>
    %c152_183 = arith.constant 152 : index
    %c0_184 = arith.constant 0 : index
    %306 = vector.load %arg6[%c152_183, %c0_184] : memref<256x256xf32, #tpu.memory_space<vmem>>, vector<8x256xf32>
    tpu.vector_store %arg6[%c152_183, %c0_184], %305 {strides = array<i32>} : memref<256x256xf32, #tpu.memory_space<vmem>>, vector<8x256xf32>,
    %c199_i32_185 = arith.constant 199 : i32
    %307 = tpu.dynamic_rotate %210 by %c199_i32_185 dim 1 : vector<8x256xf32>, i32 -> vector<8x256xf32>
    %c20_186 = arith.constant 20 : index
    %c0_187 = arith.constant 0 : index
    %308 = vector.load %arg4[%c20_186, %c0_187] : memref<27x256xf32, #tpu.memory_space<vmem>>, vector<1x256xf32>
    %309 = vector.broadcast %308 : vector<1x256xf32> to vector<8x256xf32>
    %310 = arith.mulf %307, %309 : vector<8x256xf32>
    %c160_188 = arith.constant 160 : index
    %c0_189 = arith.constant 0 : index
    %311 = vector.load %arg6[%c160_188, %c0_189] : memref<256x256xf32, #tpu.memory_space<vmem>>, vector<8x256xf32>
    tpu.vector_store %arg6[%c160_188, %c0_189], %310 {strides = array<i32>} : memref<256x256xf32, #tpu.memory_space<vmem>>, vector<8x256xf32>,
    %c193_i32_190 = arith.constant 193 : i32
    %312 = tpu.dynamic_rotate %210 by %c193_i32_190 dim 1 : vector<8x256xf32>, i32 -> vector<8x256xf32>
    %c21_191 = arith.constant 21 : index
    %c0_192 = arith.constant 0 : index
    %313 = vector.load %arg4[%c21_191, %c0_192] : memref<27x256xf32, #tpu.memory_space<vmem>>, vector<1x256xf32>
    %314 = vector.broadcast %313 : vector<1x256xf32> to vector<8x256xf32>
    %315 = arith.mulf %312, %314 : vector<8x256xf32>
    %c168_193 = arith.constant 168 : index
    %c0_194 = arith.constant 0 : index
    %316 = vector.load %arg6[%c168_193, %c0_194] : memref<256x256xf32, #tpu.memory_space<vmem>>, vector<8x256xf32>
    tpu.vector_store %arg6[%c168_193, %c0_194], %315 {strides = array<i32>} : memref<256x256xf32, #tpu.memory_space<vmem>>, vector<8x256xf32>,
    %c192_i32_195 = arith.constant 192 : i32
    %317 = tpu.dynamic_rotate %210 by %c192_i32_195 dim 1 : vector<8x256xf32>, i32 -> vector<8x256xf32>
    %c22_196 = arith.constant 22 : index
    %c0_197 = arith.constant 0 : index
    %318 = vector.load %arg4[%c22_196, %c0_197] : memref<27x256xf32, #tpu.memory_space<vmem>>, vector<1x256xf32>
    %319 = vector.broadcast %318 : vector<1x256xf32> to vector<8x256xf32>
    %320 = arith.mulf %317, %319 : vector<8x256xf32>
    %c176_198 = arith.constant 176 : index
    %c0_199 = arith.constant 0 : index
    %321 = vector.load %arg6[%c176_198, %c0_199] : memref<256x256xf32, #tpu.memory_space<vmem>>, vector<8x256xf32>
    tpu.vector_store %arg6[%c176_198, %c0_199], %320 {strides = array<i32>} : memref<256x256xf32, #tpu.memory_space<vmem>>, vector<8x256xf32>,
    %c191_i32_200 = arith.constant 191 : i32
    %322 = tpu.dynamic_rotate %210 by %c191_i32_200 dim 1 : vector<8x256xf32>, i32 -> vector<8x256xf32>
    %c23_201 = arith.constant 23 : index
    %c0_202 = arith.constant 0 : index
    %323 = vector.load %arg4[%c23_201, %c0_202] : memref<27x256xf32, #tpu.memory_space<vmem>>, vector<1x256xf32>
    %324 = vector.broadcast %323 : vector<1x256xf32> to vector<8x256xf32>
    %325 = arith.mulf %322, %324 : vector<8x256xf32>
    %c184_203 = arith.constant 184 : index
    %c0_204 = arith.constant 0 : index
    %326 = vector.load %arg6[%c184_203, %c0_204] : memref<256x256xf32, #tpu.memory_space<vmem>>, vector<8x256xf32>
    tpu.vector_store %arg6[%c184_203, %c0_204], %325 {strides = array<i32>} : memref<256x256xf32, #tpu.memory_space<vmem>>, vector<8x256xf32>,
    %c185_i32_205 = arith.constant 185 : i32
    %327 = tpu.dynamic_rotate %210 by %c185_i32_205 dim 1 : vector<8x256xf32>, i32 -> vector<8x256xf32>
    %c24_206 = arith.constant 24 : index
    %c0_207 = arith.constant 0 : index
    %328 = vector.load %arg4[%c24_206, %c0_207] : memref<27x256xf32, #tpu.memory_space<vmem>>, vector<1x256xf32>
    %329 = vector.broadcast %328 : vector<1x256xf32> to vector<8x256xf32>
    %330 = arith.mulf %327, %329 : vector<8x256xf32>
    %c192_208 = arith.constant 192 : index
    %c0_209 = arith.constant 0 : index
    %331 = vector.load %arg6[%c192_208, %c0_209] : memref<256x256xf32, #tpu.memory_space<vmem>>, vector<8x256xf32>
    tpu.vector_store %arg6[%c192_208, %c0_209], %330 {strides = array<i32>} : memref<256x256xf32, #tpu.memory_space<vmem>>, vector<8x256xf32>,
    %c184_i32_210 = arith.constant 184 : i32
    %332 = tpu.dynamic_rotate %210 by %c184_i32_210 dim 1 : vector<8x256xf32>, i32 -> vector<8x256xf32>
    %c25_211 = arith.constant 25 : index
    %c0_212 = arith.constant 0 : index
    %333 = vector.load %arg4[%c25_211, %c0_212] : memref<27x256xf32, #tpu.memory_space<vmem>>, vector<1x256xf32>
    %334 = vector.broadcast %333 : vector<1x256xf32> to vector<8x256xf32>
    %335 = arith.mulf %332, %334 : vector<8x256xf32>
    %c200_213 = arith.constant 200 : index
    %c0_214 = arith.constant 0 : index
    %336 = vector.load %arg6[%c200_213, %c0_214] : memref<256x256xf32, #tpu.memory_space<vmem>>, vector<8x256xf32>
    tpu.vector_store %arg6[%c200_213, %c0_214], %335 {strides = array<i32>} : memref<256x256xf32, #tpu.memory_space<vmem>>, vector<8x256xf32>,
    %c183_i32_215 = arith.constant 183 : i32
    %337 = tpu.dynamic_rotate %210 by %c183_i32_215 dim 1 : vector<8x256xf32>, i32 -> vector<8x256xf32>
    %c26_216 = arith.constant 26 : index
    %c0_217 = arith.constant 0 : index
    %338 = vector.load %arg4[%c26_216, %c0_217] : memref<27x256xf32, #tpu.memory_space<vmem>>, vector<1x256xf32>
    %339 = vector.broadcast %338 : vector<1x256xf32> to vector<8x256xf32>
    %340 = arith.mulf %337, %339 : vector<8x256xf32>
    %c208_218 = arith.constant 208 : index
    %c0_219 = arith.constant 0 : index
    %341 = vector.load %arg6[%c208_218, %c0_219] : memref<256x256xf32, #tpu.memory_space<vmem>>, vector<8x256xf32>
    tpu.vector_store %arg6[%c208_218, %c0_219], %340 {strides = array<i32>} : memref<256x256xf32, #tpu.memory_space<vmem>>, vector<8x256xf32>,
    %c0_220 = arith.constant 0 : index
    %c0_221 = arith.constant 0 : index
    %342 = vector.load %arg3[%c0_220, %c0_221] : memref<16x256xf32, #tpu.memory_space<vmem>>, vector<16x256xf32>
    %c0_222 = arith.constant 0 : index
    %c0_223 = arith.constant 0 : index
    %343 = vector.load %arg6[%c0_222, %c0_223] : memref<256x256xf32, #tpu.memory_space<vmem>>, vector<256x256xf32>
    %cst_224 = arith.constant dense<0.000000e+00> : vector<16x256xf32>
    %344 = tpu.matmul %342, %343, %cst_224 {dimension_numbers = #tpu.dot_dimension_numbers<[1], [0], [0], [1], [0, 0, 1, 1], [], []>} : vector<16x256xf32>, vector<256x256xf32>, vector<16x256xf32> -> vector<16x256xf32>
    %345 = vector.extract_strided_slice %344 {offsets = [8, 0], sizes = [8, 256], strides = [1, 1]} : vector<16x256xf32> to vector<8x256xf32>
    %cst_225 = arith.constant dense<0.000000e+00> : vector<8xf32>
    %346 = vector.multi_reduction <add>, %345, %cst_225 [1] : vector<8x256xf32> to vector<8xf32>
    %347 = vector.shape_cast %346 : vector<8xf32> to vector<8x1xf32>
    %cst_226 = arith.constant 3.906250e-03 : f32
    %348 = vector.broadcast %cst_226 : f32 to vector<8x1xf32>
    %349 = arith.mulf %347, %348 : vector<8x1xf32>
    %350 = arith.mulf %345, %345 : vector<8x256xf32>
    %cst_227 = arith.constant dense<0.000000e+00> : vector<8xf32>
    %351 = vector.multi_reduction <add>, %350, %cst_227 [1] : vector<8x256xf32> to vector<8xf32>
    %352 = vector.shape_cast %351 : vector<8xf32> to vector<8x1xf32>
    %cst_228 = arith.constant 3.906250e-03 : f32
    %353 = vector.broadcast %cst_228 : f32 to vector<8x1xf32>
    %354 = arith.mulf %352, %353 : vector<8x1xf32>
    %355 = arith.mulf %349, %349 : vector<8x1xf32>
    %356 = arith.subf %354, %355 : vector<8x1xf32>
    %cst_229 = arith.constant 0.000000e+00 : f32
    %357 = vector.broadcast %cst_229 : f32 to vector<8x1xf32>
    %358 = arith.maximumf %356, %357 : vector<8x1xf32>
    %359 = vector.broadcast %349 : vector<8x1xf32> to vector<8x256xf32>
    %360 = arith.subf %345, %359 : vector<8x256xf32>
    %cst_230 = arith.constant 9.99999974E-6 : f32
    %361 = vector.broadcast %cst_230 : f32 to vector<8x1xf32>
    %362 = arith.addf %358, %361 : vector<8x1xf32>
    %363 = math.rsqrt %362 : vector<8x1xf32>
    %364 = vector.broadcast %363 : vector<8x1xf32> to vector<8x256xf32>
    %365 = arith.mulf %360, %364 : vector<8x256xf32>
    %366 = vector.extract_strided_slice %344 {offsets = [0, 0], sizes = [8, 256], strides = [1, 1]} : vector<16x256xf32> to vector<8x256xf32>
    %cst_231 = arith.constant dense<0.000000e+00> : vector<8xf32>
    %367 = vector.multi_reduction <add>, %366, %cst_231 [1] : vector<8x256xf32> to vector<8xf32>
    %368 = vector.shape_cast %367 : vector<8xf32> to vector<8x1xf32>
    %cst_232 = arith.constant 3.906250e-03 : f32
    %369 = vector.broadcast %cst_232 : f32 to vector<8x1xf32>
    %370 = arith.mulf %368, %369 : vector<8x1xf32>
    %371 = arith.mulf %366, %366 : vector<8x256xf32>
    %cst_233 = arith.constant dense<0.000000e+00> : vector<8xf32>
    %372 = vector.multi_reduction <add>, %371, %cst_233 [1] : vector<8x256xf32> to vector<8xf32>
    %373 = vector.shape_cast %372 : vector<8xf32> to vector<8x1xf32>
    %cst_234 = arith.constant 3.906250e-03 : f32
    %374 = vector.broadcast %cst_234 : f32 to vector<8x1xf32>
    %375 = arith.mulf %373, %374 : vector<8x1xf32>
    %376 = arith.mulf %370, %370 : vector<8x1xf32>
    %377 = arith.subf %375, %376 : vector<8x1xf32>
    %cst_235 = arith.constant 0.000000e+00 : f32
    %378 = vector.broadcast %cst_235 : f32 to vector<8x1xf32>
    %379 = arith.maximumf %377, %378 : vector<8x1xf32>
    %380 = vector.broadcast %370 : vector<8x1xf32> to vector<8x256xf32>
    %381 = arith.subf %366, %380 : vector<8x256xf32>
    %cst_236 = arith.constant 9.99999974E-6 : f32
    %382 = vector.broadcast %cst_236 : f32 to vector<8x1xf32>
    %383 = arith.addf %379, %382 : vector<8x1xf32>
    %384 = math.rsqrt %383 : vector<8x1xf32>
    %385 = vector.broadcast %384 : vector<8x1xf32> to vector<8x256xf32>
    %386 = arith.mulf %381, %385 : vector<8x256xf32>
    %cst_237 = arith.constant 0.000000e+00 : f32
    %387 = vector.broadcast %cst_237 : f32 to vector<8x256xf32>
    %388 = arith.cmpf oge, %386, %387 : vector<8x256xf32>
    %cst_238 = arith.constant 0.00999999977 : f32
    %389 = vector.broadcast %cst_238 : f32 to vector<8x256xf32>
    %390 = arith.mulf %386, %389 : vector<8x256xf32>
    %391 = arith.select %388, %386, %390 : vector<8x256xi1>, vector<8x256xf32>
    %392 = arith.addf %391, %365 : vector<8x256xf32>
    %cst_239 = arith.constant 0.000000e+00 : f32
    %393 = vector.broadcast %cst_239 : f32 to vector<8x256xf32>
    %394 = arith.cmpf oge, %392, %393 : vector<8x256xf32>
    %cst_240 = arith.constant 0.00999999977 : f32
    %395 = vector.broadcast %cst_240 : f32 to vector<8x256xf32>
    %396 = arith.mulf %392, %395 : vector<8x256xf32>
    %397 = arith.select %394, %392, %396 : vector<8x256xi1>, vector<8x256xf32>
    %cst_241 = arith.constant dense<0.000000e+00> : vector<8xf32>
    %398 = vector.multi_reduction <add>, %397, %cst_241 [1] : vector<8x256xf32> to vector<8xf32>
    %399 = vector.shape_cast %398 : vector<8xf32> to vector<8x1xf32>
    %cst_242 = arith.constant 3.906250e-03 : f32
    %400 = vector.broadcast %cst_242 : f32 to vector<8x1xf32>
    %401 = arith.mulf %399, %400 : vector<8x1xf32>
    %402 = arith.mulf %397, %397 : vector<8x256xf32>
    %cst_243 = arith.constant dense<0.000000e+00> : vector<8xf32>
    %403 = vector.multi_reduction <add>, %402, %cst_243 [1] : vector<8x256xf32> to vector<8xf32>
    %404 = vector.shape_cast %403 : vector<8xf32> to vector<8x1xf32>
    %cst_244 = arith.constant 3.906250e-03 : f32
    %405 = vector.broadcast %cst_244 : f32 to vector<8x1xf32>
    %406 = arith.mulf %404, %405 : vector<8x1xf32>
    %407 = arith.mulf %401, %401 : vector<8x1xf32>
    %408 = arith.subf %406, %407 : vector<8x1xf32>
    %cst_245 = arith.constant 0.000000e+00 : f32
    %409 = vector.broadcast %cst_245 : f32 to vector<8x1xf32>
    %410 = arith.maximumf %408, %409 : vector<8x1xf32>
    %411 = vector.broadcast %401 : vector<8x1xf32> to vector<8x256xf32>
    %412 = arith.subf %397, %411 : vector<8x256xf32>
    %cst_246 = arith.constant 9.99999974E-6 : f32
    %413 = vector.broadcast %cst_246 : f32 to vector<8x1xf32>
    %414 = arith.addf %410, %413 : vector<8x1xf32>
    %415 = math.rsqrt %414 : vector<8x1xf32>
    %416 = vector.broadcast %415 : vector<8x1xf32> to vector<8x256xf32>
    %417 = arith.mulf %412, %416 : vector<8x256xf32>
    %c0_247 = arith.constant 0 : index
    %c0_248 = arith.constant 0 : index
    %c0_249 = arith.constant 0 : index
    %418 = vector.load %arg5[%c0_247, %c0_248, %c0_249] : memref<1x8x256xf32, #tpu.memory_space<vmem>>, vector<1x8x256xf32>
    %419 = vector.shape_cast %418 : vector<1x8x256xf32> to vector<8x256xf32>
    %420 = vector.shape_cast %417 : vector<8x256xf32> to vector<1x8x256xf32>
    tpu.vector_store %arg5[%c0_247, %c0_248, %c0_249], %420 {strides = array<i32>} : memref<1x8x256xf32, #tpu.memory_space<vmem>>, vector<1x8x256xf32>,
    return
  }
  func.func @transform_0(%arg0: i32) -> (i32, i32, i32) {
    %c0_i32 = arith.constant 0 : i32
    %c0_i32_0 = arith.constant 0 : i32
    %c0_i32_1 = arith.constant 0 : i32
    return %arg0, %c0_i32, %c0_i32_0 : i32, i32, i32
  }
  func.func @transform_1(%arg0: i32) -> (i32, i32) {
    %c0_i32 = arith.constant 0 : i32
    %c0_i32_0 = arith.constant 0 : i32
    %c0_i32_1 = arith.constant 0 : i32
    return %c0_i32, %c0_i32_0 : i32, i32
  }
  func.func @transform_2(%arg0: i32) -> (i32, i32) {
    %c0_i32 = arith.constant 0 : i32
    %c0_i32_0 = arith.constant 0 : i32
    %c0_i32_1 = arith.constant 0 : i32
    return %c0_i32, %c0_i32_0 : i32, i32
  }
  func.func @transform_3(%arg0: i32) -> (i32, i32) {
    %c0_i32 = arith.constant 0 : i32
    %c0_i32_0 = arith.constant 0 : i32
    %c0_i32_1 = arith.constant 0 : i32
    return %c0_i32, %c0_i32_0 : i32, i32
  }
  func.func @transform_4(%arg0: i32) -> (i32, i32, i32) {
    %c0_i32 = arith.constant 0 : i32
    %c0_i32_0 = arith.constant 0 : i32
    %c0_i32_1 = arith.constant 0 : i32
    return %arg0, %c0_i32, %c0_i32_0 : i32, i32, i32
  }
}

</mosaic_0001>

<bundles_post_ra>
// kernel: respath_forward.1
= control target key start
LH: loop header
LB: loop body
LE: loop exit
PB: predicated region body
PF: predicated region fallthrough
CT: control target
= control target key end

     0   :  { %s1933_s15 = smov 0   ;;  %s2692_s0 = inlined_call_operand.vmem [shape: f32[2,8,256], index: 0, kind: input, shape index: {}]   ;;  %s2693_s1 = inlined_call_operand.vmem [shape: f32[16,256], index: 1, kind: input, shape index: {}]   ;;  %s2694_s2 = inlined_call_operand.vmem [shape: f32[16,256], index: 2, kind: input, shape index: {}]   ;;  %s2695_s3 = inlined_call_operand.vmem [shape: f32[27,256], index: 3, kind: input, shape index: {}]   ;;  %s2696_s4 = inlined_call_operand.vmem [shape: f32[2,8,256], index: 4, kind: output, shape index: {}]  }
   0x1 LB: > { %s1783_s16 = sadd.s32 4294967295, %s1889_s15   ;;  %p1787_p0 = scmp.ge.s32.totalorder %s1889_s15, 1  ;;  %s1889_s15 = sphi %s1933_s15, %s14_s15  }
   0x2   : > { %p162_p1 = scmp.lt.s32.totalorder %s1889_s15, 3 }
   0x4   : > { %p163_p2 = pnand %p1787_p0, %p162_p1 }
   0x5   : > { %p188_p3 = scmp.lt.s32.totalorder (!%p163_p2), %s1783_s16, 1  ;;  %s1891_s21 = smov (!%p163_p2), 127  }
   0x6   : > { %166 = sbr.rel (%p163_p2) target bundleno = 1492 (0x5d4), region = 36  ;;  %s1892_s22 = smov (!%p163_p2), 121  }
   0x7   : > { %s1893_s23 = smov (!%p163_p2), 1   ;;  %s1894_s24 = smov (!%p163_p2), 7  }
   0x8   : > { %s1895_s25 = smov (!%p163_p2), 8   ;;  %s1896_s26 = smov (!%p163_p2), 9  }
   0x9   : > { %s1897_s27 = smov (!%p163_p2), 55   ;;  %s1898_s28 = smov (!%p163_p2), 56  }
   0xa   : > { %s1899_s29 = smov (!%p163_p2), 57   ;;  %s1900_s30 = smov (!%p163_p2), 63  }
   0xb   : > { %s2713_s16 = smov (!%p188_p3, %s1783_s16), 1  ;;  %s1901_s5 = smov 64   ;;  %v775_v2 = vld [vmem:[%s2693_s1 + $0x8] sm:$0xff]  ;;  %v214_v3 = vlaneseq  ;;  %v1805_v8 = vld [vmem:[%s2695_s3 + $0x17] ss:$8 sm:$0x3] }
   0xc   : > { %s1844_s17 = sshll.u32 %s2713_s16, 4  ;;  %s1902_s6 = smov 65   ;;  %906 = vmatprep.mubr.f32.mxu0 %v775_v2  ;;  %v1804_v11 = vld [vmem:[%s2695_s3 + $0x16] ss:$8 sm:$0x3] }
   0xd   : > { %s192_s20 = scalar_lea.vmem %s2692_s0, %s1844_s17  ;;  %s1903_s7 = smov 71   ;;  %v222_v4 = vshrl.u32 %v214_v3, 7  ;;  %v2024_v5 = vand.u32 127, %v214_v3  ;;  %v1803_v21 = vld [vmem:[%s2695_s3 + $0x14] ss:$8 sm:$0x3] }
   0xe   : > { %v1949_v0 = vld [vmem:[%s192_s20] sm:$0xff]  ;;  %v1955_v1 = vld [vmem:[%s192_s20 + $0x8] sm:$0xff]  ;;  %s1904_s8 = smov 72   ;;  %s1905_s9 = smov 73  }
   0xf   : > { %525 = vrot.lane.b32.xlu1 %v1949_v0, %s1891_s21  ;;  %549 = vrot.lane.b32.xlu0 %v1949_v0, %s1892_s22  ;;  %s1906_s10 = smov 119   ;;  %s1907_s11 = smov 120   ;;  %v2026_v6 = vsub.s32 0, %v222_v4  ;;  %v2028_v7 = vsub.s32 1, %v222_v4  ;;  %vm529_vm0 = vcmp.lt.s32.totalorder %v2024_v5, 127  ;;  %vm553_vm1 = vcmp.lt.s32.totalorder %v2024_v5, 121 }
  0x10   : > { %vm503_vm2 = vcmp.lt.s32.totalorder %v2024_v5, 1  ;;  %v1802_v25 = vld [vmem:[%s2695_s3 + $0x13] ss:$8 sm:$0x3]  ;;  %vm479_vm3 = vcmp.lt.s32.totalorder %v2024_v5, 7  ;;  %vm455_vm4 = vcmp.lt.s32.totalorder %v2024_v5, 8 }
  0x11   : > { %v566_v12 = vrot.slane %v1805_v8, %v2028_v7  ;;  %v562_v13 = vrot.slane %v1805_v8, %v2026_v6  ;;  %v542_v14 = vrot.slane %v1804_v11, %v2028_v7  ;;  %v538_v17 = vrot.slane %v1804_v11, %v2026_v6  ;;  %v1801_v36 = vld [vmem:[%s2695_s3 + $0x12] ss:$8 sm:$0x3]  ;;  %v1800_v47 = vld [vmem:[%s2695_s3 + $0x11] ss:$8 sm:$0x3] }
  0x12   : > { %v516_v28 = vrot.slane %v1803_v21, %v2028_v7  ;;  %v512_v31 = vrot.slane %v1803_v21, %v2026_v6  ;;  %v488_v34 = vrot.slane %v1802_v25, %v2026_v6  ;;  %v492_v35 = vrot.slane %v1802_v25, %v2028_v7  ;;  %v1799_v56 = vld [vmem:[%s2695_s3 + $0x10] ss:$8 sm:$0x3] }
  0x13   : > { %527 = vrot.lane.b32.xlu1 %v1955_v1, %s1891_s21  ;;  %551 = vrot.lane.b32.xlu0 %v1955_v1, %s1892_s22  ;;  %v464_v45 = vrot.slane %v1801_v36, %v2026_v6  ;;  %v468_v46 = vrot.slane %v1801_v36, %v2028_v7  ;;  %vm431_vm5 = vcmp.lt.s32.totalorder %v2024_v5, 9  ;;  %v440_v54 = vrot.slane %v1800_v47, %v2026_v6 }
  0x14   : > { %v444_v55 = vrot.slane %v1800_v47, %v2028_v7  ;;  %vm407_vm6 = vcmp.lt.s32.totalorder %v2024_v5, 55  ;;  %v416_v63 = vrot.slane %v1799_v56, %v2026_v6  ;;  %vm383_vm7 = vcmp.lt.s32.totalorder %v2024_v5, 56 }
  0x15   : > { %vm359_vm8 = vcmp.lt.s32.totalorder %v2024_v5, 57  ;;  %vm335_vm9 = vcmp.lt.s32.totalorder %v2024_v5, 63  ;;  %vm311_vm10 = vcmp.lt.s32.totalorder %v2024_v5, 64  ;;  %vm287_vm11 = vcmp.lt.s32.totalorder %v2024_v5, 65 }
  0x16   : > { %vm2701_vm12 = vcmp.lt.s32.totalorder %v2024_v5, 71  ;;  %vm2700_vm13 = vcmp.lt.s32.totalorder %v2024_v5, 72  ;;  %vm2697_vm14 = vcmp.lt.s32.totalorder %v2024_v5, 73  ;;  %vm2699_vm15 = vcmp.lt.s32.totalorder %v2024_v5, 119 }
  0x17   : > { %501 = vrot.lane.b32.xlu1 %v1955_v1, %s1893_s23  ;;  %499 = vrot.lane.b32.xlu0 %v1949_v0, %s1893_s23 }
  0x1b   : > { %477 = vrot.lane.b32.xlu1 %v1955_v1, %s1894_s24  ;;  %475 = vrot.lane.b32.xlu0 %v1949_v0, %s1894_s24 }
  0x1f   : > { %453 = vrot.lane.b32.xlu1 %v1955_v1, %s1895_s25  ;;  %451 = vrot.lane.b32.xlu0 %v1949_v0, %s1895_s25 }
  0x23   : > { %429 = vrot.lane.b32.xlu1 %v1955_v1, %s1896_s26  ;;  %427 = vrot.lane.b32.xlu0 %v1949_v0, %s1896_s26 }
  0x27   : > { %405 = vrot.lane.b32.xlu1 %v1955_v1, %s1897_s27  ;;  %403 = vrot.lane.b32.xlu0 %v1949_v0, %s1897_s27 }
  0x2b   : > { %381 = vrot.lane.b32.xlu1 %v1955_v1, %s1898_s28  ;;  %379 = vrot.lane.b32.xlu0 %v1949_v0, %s1898_s28 }
  0x2f   : > { %357 = vrot.lane.b32.xlu1 %v1955_v1, %s1899_s29  ;;  %355 = vrot.lane.b32.xlu0 %v1949_v0, %s1899_s29 }
  0x33   : > { %333 = vrot.lane.b32.xlu1 %v1955_v1, %s1900_s30  ;;  %331 = vrot.lane.b32.xlu0 %v1949_v0, %s1900_s30 }
  0x37   : > { %309 = vrot.lane.b32.xlu1 %v1955_v1, %s1901_s5  ;;  %307 = vrot.lane.b32.xlu0 %v1949_v0, %s1901_s5 }
  0x3b   : > { %285 = vrot.lane.b32.xlu1 %v1955_v1, %s1902_s6  ;;  %283 = vrot.lane.b32.xlu0 %v1949_v0, %s1902_s6 }
  0x3f   : > { %261 = vrot.lane.b32.xlu1 %v1955_v1, %s1903_s7  ;;  %259 = vrot.lane.b32.xlu0 %v1949_v0, %s1903_s7 }
  0x43   : > { %237 = vrot.lane.b32.xlu1 %v1955_v1, %s1904_s8  ;;  %235 = vrot.lane.b32.xlu0 %v1949_v0, %s1904_s8 }
  0x47   : > { %212 = vrot.lane.b32.xlu1 %v1955_v1, %s1905_s9  ;;  %210 = vrot.lane.b32.xlu0 %v1949_v0, %s1905_s9 }
  0x4b   : > { %599 = vrot.lane.b32.xlu1 %v1955_v1, %s1906_s10  ;;  %597 = vrot.lane.b32.xlu0 %v1949_v0, %s1906_s10 }
  0x4f   : > { %575 = vrot.lane.b32.xlu1 %v1955_v1, %s1907_s11  ;;  %573 = vrot.lane.b32.xlu0 %v1949_v0, %s1907_s11 }
  0x81   : > { %v526_v9 = vpop.permute.xlu1 %525  ;;  %v550_v10 = vpop.permute.xlu0 %549 }
  0x85   : > { %v528_v15 = vpop.permute.xlu1 %527  ;;  %v552_v16 = vpop.permute.xlu0 %551 }
  0x86   : > { %v531_v18 = vsel %vm529_vm0, %v528_v15, %v526_v9  ;;  %v554_v19 = vsel %vm553_vm1, %v550_v10, %v552_v16  ;;  %v555_v20 = vsel %vm553_vm1, %v552_v16, %v550_v10  ;;  %v530_v22 = vsel %vm529_vm0, %v526_v9, %v528_v15 }
  0x87   : > { %v570_v23 = vmul.f32 %v566_v12, %v555_v20  ;;  %v569_v24 = vmul.f32 %v562_v13, %v554_v19  ;;  %v546_v26 = vmul.f32 %v542_v14, %v531_v18  ;;  %v545_v30 = vmul.f32 %v538_v17, %v530_v22  ;;  %v1797_v13 = vld [vmem:[%s2695_s3 + $0x6] ss:$8 sm:$0x3]  ;;  %v1796_v22 = vld [vmem:[%s2695_s3 + $0x5] ss:$8 sm:$0x3] }
  0x88   : > { %v368_v20 = vrot.slane %v1797_v13, %v2026_v6  ;;  %v372_v21 = vrot.slane %v1797_v13, %v2028_v7 }
  0x89   : > { %v502_v27 = vpop.permute.xlu1 %501  ;;  %842 = vmatprep.subr.mxu0 %v570_v23  ;;  %v500_v29 = vpop.permute.xlu0 %499 }
  0x8a   : > { %v504_v32 = vsel %vm503_vm2, %v500_v29, %v502_v27  ;;  %843 = vmatpush1.msra.mxu0 %v569_v24  ;;  %v505_v33 = vsel %vm503_vm2, %v502_v27, %v500_v29  ;;  %v344_v29 = vrot.slane %v1796_v22, %v2026_v6 }
  0x8b   : > { %844 = vmatprep.subr.mxu0 %v546_v26  ;;  %v520_v37 = vmul.f32 %v516_v28, %v504_v32  ;;  %v519_v40 = vmul.f32 %v512_v31, %v505_v33  ;;  %v1795_v31 = vld [vmem:[%s2695_s3 + $0x4] ss:$8 sm:$0x3] }
  0x8c   : > { %845 = vmatpush1.msra.mxu0 %v545_v30  ;;  %v348_v30 = vrot.slane %v1796_v22, %v2028_v7 }
  0x8d   : > { %v478_v38 = vpop.permute.xlu1 %477  ;;  %846 = vmatprep.subr.mxu0 %v1955_v1  ;;  %v476_v39 = vpop.permute.xlu0 %475  ;;  %v1798_v1 = vld [vmem:[%s2695_s3 + $0x7] ss:$8 sm:$0x3] }
  0x8e   : > { %v480_v41 = vsel %vm479_vm3, %v476_v39, %v478_v38  ;;  %v481_v42 = vsel %vm479_vm3, %v478_v38, %v476_v39  ;;  %847 = vmatpush1.msra.mxu0 %v1949_v0  ;;  %v420_v0 = vrot.slane %v1799_v56, %v2028_v7  ;;  %v392_v11 = vrot.slane %v1798_v1, %v2026_v6 }
  0x8f   : > { %v495_v43 = vmul.f32 %v488_v34, %v481_v42  ;;  %v496_v44 = vmul.f32 %v492_v35, %v480_v41  ;;  %848 = vmatprep.subr.mxu0 %v520_v37  ;;  %v396_v12 = vrot.slane %v1798_v1, %v2028_v7  ;;  %v320_v38 = vrot.slane %v1795_v31, %v2026_v6 }
  0x90   : > { %849 = vmatpush1.msra.mxu0 %v519_v40  ;;  %v324_v39 = vrot.slane %v1795_v31, %v2028_v7  ;;  %v1794_v40 = vld [vmem:[%s2695_s3 + $0x3] ss:$8 sm:$0x3] }
  0x91   : > { %v454_v48 = vpop.permute.xlu1 %453  ;;  %850 = vmatprep.subr.mxu0 %v496_v44  ;;  %v452_v49 = vpop.permute.xlu0 %451  ;;  %v296_v47 = vrot.slane %v1794_v40, %v2026_v6 }
  0x92   : > { %v456_v50 = vsel %vm455_vm4, %v452_v49, %v454_v48  ;;  %v457_v51 = vsel %vm455_vm4, %v454_v48, %v452_v49  ;;  %851 = vmatpush1.msra.mxu0 %v495_v43  ;;  %v300_v48 = vrot.slane %v1794_v40, %v2028_v7  ;;  %v1793_v49 = vld [vmem:[%s2695_s3 + $0x2] ss:$8 sm:$0x3] }
  0x93   : > { %v471_v52 = vmul.f32 %v464_v45, %v457_v51  ;;  %v472_v53 = vmul.f32 %v468_v46, %v456_v50  ;;  %v272_v56 = vrot.slane %v1793_v49, %v2026_v6 }
  0x95   : > { %v430_v57 = vpop.permute.xlu1 %429  ;;  %852 = vmatprep.subr.mxu0 %v472_v53  ;;  %v428_v58 = vpop.permute.xlu0 %427 }
  0x96   : > { %v432_v59 = vsel %vm431_vm5, %v428_v58, %v430_v57  ;;  %v433_v60 = vsel %vm431_vm5, %v430_v57, %v428_v58  ;;  %853 = vmatpush1.msra.mxu0 %v471_v52  ;;  %v276_v57 = vrot.slane %v1793_v49, %v2028_v7  ;;  %v1792_v58 = vld [vmem:[%s2695_s3 + $0x1] ss:$8 sm:$0x3] }
  0x97   : > { %v447_v61 = vmul.f32 %v440_v54, %v433_v60  ;;  %v448_v62 = vmul.f32 %v444_v55, %v432_v59  ;;  %v248_v1 = vrot.slane %v1792_v58, %v2026_v6 }
  0x99   : > { %v406_v2 = vpop.permute.xlu1 %405  ;;  %854 = vmatprep.subr.mxu0 %v448_v62  ;;  %v404_v3 = vpop.permute.xlu0 %403 }
  0x9a   : > { %v2103_v4 = vsel %vm407_vm6, %v404_v3, %v406_v2  ;;  %v2107_v8 = vsel %vm407_vm6, %v406_v2, %v404_v3  ;;  %855 = vmatpush1.msra.mxu0 %v447_v61  ;;  %v252_v2 = vrot.slane %v1792_v58, %v2028_v7  ;;  %v219_v3 = vld [vmem:[%s2695_s3] ss:$8 sm:$0x3] }
  0x9b   : > { %v423_v9 = vmul.f32 %v416_v63, %v2107_v8  ;;  %v424_v10 = vmul.f32 %v420_v0, %v2103_v4 }
  0x9d   : > { %v382_v14 = vpop.permute.xlu1 %381  ;;  %856 = vmatprep.subr.mxu0 %v424_v10  ;;  %v380_v15 = vpop.permute.xlu0 %379 }
  0x9e   : > { %v2119_v16 = vsel %vm383_vm7, %v380_v15, %v382_v14  ;;  %v2123_v17 = vsel %vm383_vm7, %v382_v14, %v380_v15  ;;  %857 = vmatpush1.msra.mxu0 %v423_v9 }
  0x9f   : > { %v399_v18 = vmul.f32 %v392_v11, %v2123_v17  ;;  %v400_v19 = vmul.f32 %v396_v12, %v2119_v16  ;;  %v1816_v11 = vld [vmem:[%s2695_s3 + $0x32] ss:$8 sm:$0x3] }
  0xa1   : > { %v358_v23 = vpop.permute.xlu1 %357  ;;  %858 = vmatprep.subr.mxu0 %v400_v19  ;;  %v356_v24 = vpop.permute.xlu0 %355  ;;  %v228_v19 = vrot.slane %v219_v3, %v2028_v7 }
  0xa2   : > { %v2135_v25 = vsel %vm359_vm8, %v356_v24, %v358_v23  ;;  %v2139_v26 = vsel %vm359_vm8, %v358_v23, %v356_v24  ;;  %859 = vmatpush1.msra.mxu0 %v399_v18  ;;  %v224_v18 = vrot.slane %v219_v3, %v2026_v6  ;;  %v763_v24 = vrot.slane %v1816_v11, %v2026_v6 }
  0xa3   : > { %v375_v27 = vmul.f32 %v368_v20, %v2139_v26  ;;  %v376_v28 = vmul.f32 %v372_v21, %v2135_v25  ;;  %v1815_v20 = vld [vmem:[%s2695_s3 + $0x31] ss:$8 sm:$0x3]  ;;  %v767_v21 = vrot.slane %v1816_v11, %v2028_v7 }
  0xa5   : > { %v334_v32 = vpop.permute.xlu1 %333  ;;  %860 = vmatprep.subr.mxu0 %v376_v28  ;;  %v332_v33 = vpop.permute.xlu0 %331 }
  0xa6   : > { %v2151_v34 = vsel %vm335_vm9, %v332_v33, %v334_v32  ;;  %v2155_v35 = vsel %vm335_vm9, %v334_v32, %v332_v33  ;;  %861 = vmatpush1.msra.mxu0 %v375_v27  ;;  %v1814_v27 = vld [vmem:[%s2695_s3 + $0x30] ss:$8 sm:$0x3]  ;;  %v746_v33 = vrot.slane %v1815_v20, %v2026_v6 }
  0xa7   : > { %v351_v36 = vmul.f32 %v344_v29, %v2155_v35  ;;  %v352_v37 = vmul.f32 %v348_v30, %v2151_v34  ;;  %v750_v30 = vrot.slane %v1815_v20, %v2028_v7  ;;  %v729_v40 = vrot.slane %v1814_v27, %v2026_v6 }
  0xa9   : > { %v310_v41 = vpop.permute.xlu1 %309  ;;  %862 = vmatprep.subr.mxu0 %v352_v37  ;;  %v308_v42 = vpop.permute.xlu0 %307  ;;  %v771_v37 = vmul.f32 %v767_v21, %v2107_v8  ;;  %v736_v49 = vmul.f32 %v729_v40, %v2135_v25  ;;  %v1809_v25 = vld [vmem:[%s2695_s3 + $0x23] ss:$8 sm:$0x3] }
  0xaa   : > { %v2167_v43 = vsel %vm311_vm10, %v308_v42, %v310_v41  ;;  %v2171_v44 = vsel %vm311_vm10, %v310_v41, %v308_v42  ;;  %863 = vmatpush1.msra.mxu0 %v351_v36  ;;  %v1813_v36 = vld [vmem:[%s2695_s3 + $0x27] ss:$8 sm:$0x3]  ;;  %v1812_v41 = vld [vmem:[%s2695_s3 + $0x26] ss:$8 sm:$0x3]  ;;  %v754_v42 = vmul.f32 %v750_v30, %v2123_v17 }
  0xab   : > { %v327_v45 = vmul.f32 %v320_v38, %v2171_v44  ;;  %v328_v46 = vmul.f32 %v324_v39, %v2167_v43  ;;  %v733_v38 = vrot.slane %v1814_v27, %v2028_v7  ;;  %v770_v39 = vmul.f32 %v763_v24, %v2103_v4  ;;  %v1811_v4 = vld [vmem:[%s2695_s3 + $0x25] ss:$8 sm:$0x3] }
  0xac   : > { %v712_v8 = vrot.slane %v1813_v36, %v2026_v6  ;;  %v695_v17 = vrot.slane %v1812_v41, %v2026_v6 }
  0xad   : > { %v286_v50 = vpop.permute.xlu1 %285  ;;  %864 = vmatprep.subr.mxu0 %v328_v46  ;;  %v284_v51 = vpop.permute.xlu0 %283  ;;  %v753_v46 = vmul.f32 %v746_v33, %v2119_v16  ;;  %v1810_v16 = vld [vmem:[%s2695_s3 + $0x24] ss:$8 sm:$0x3] }
  0xae   : > { %v2183_v52 = vsel %vm287_vm11, %v284_v51, %v286_v50  ;;  %v2187_v53 = vsel %vm287_vm11, %v286_v50, %v284_v51  ;;  %865 = vmatpush1.msra.mxu0 %v327_v45  ;;  %v716_v45 = vrot.slane %v1813_v36, %v2028_v7  ;;  %v682_v51 = vrot.slane %v1811_v4, %v2028_v7 }
  0xaf   : > { %v303_v54 = vmul.f32 %v296_v47, %v2187_v53  ;;  %v304_v55 = vmul.f32 %v300_v48, %v2183_v52  ;;  %v737_v47 = vmul.f32 %v733_v38, %v2139_v26  ;;  %v699_v48 = vrot.slane %v1812_v41, %v2028_v7 }
  0xb0   : > { %v720_v50 = vmul.f32 %v716_v45, %v2155_v35  ;;  %v719_v26 = vmul.f32 %v712_v8, %v2151_v34  ;;  %v665_v58 = vrot.slane %v1810_v16, %v2028_v7  ;;  %v702_v35 = vmul.f32 %v695_v17, %v2167_v43  ;;  %v1808_v34 = vld [vmem:[%s2695_s3 + $0x22] ss:$8 sm:$0x3]  ;;  %v1807_v43 = vld [vmem:[%s2695_s3 + $0x21] ss:$8 sm:$0x3] }
  0xb1   : > { %v262_v59 = vpop.permute.xlu1 %261  ;;  %866 = vmatprep.subr.mxu0 %v304_v55  ;;  %v260_v60 = vpop.permute.xlu0 %259 }
  0xb2   : > { %v2199_v61 = vsel %vm2701_vm12, %v260_v60, %v262_v59  ;;  %v2203_v62 = vsel %vm2701_vm12, %v262_v59, %v260_v60  ;;  %867 = vmatpush1.msra.mxu0 %v303_v54  ;;  %v661_v59 = vrot.slane %v1810_v16, %v2026_v6  ;;  %v686_v60 = vmul.f32 %v682_v51, %v2187_v53 }
  0xb3   : > { %v279_v63 = vmul.f32 %v272_v56, %v2203_v62  ;;  %v280_v0 = vmul.f32 %v276_v57, %v2199_v61  ;;  %v678_v56 = vrot.slane %v1811_v4, %v2026_v6  ;;  %v703_v57 = vmul.f32 %v699_v48, %v2171_v44 }
  0xb4   : > { %v644_v44 = vrot.slane %v1809_v25, %v2026_v6  ;;  %v631_v53 = vrot.slane %v1808_v34, %v2028_v7 }
  0xb5   : > { %v238_v9 = vpop.permute.xlu1 %237  ;;  %868 = vmatprep.subr.mxu0 %v280_v0  ;;  %v236_v10 = vpop.permute.xlu0 %235  ;;  %v685_v0 = vmul.f32 %v678_v56, %v2183_v52 }
  0xb6   : > { %v2218_v12 = vsel %vm2700_vm13, %v236_v10, %v238_v9  ;;  %v2222_v13 = vsel %vm2700_vm13, %v238_v9, %v236_v10  ;;  %869 = vmatpush1.msra.mxu0 %v279_v63  ;;  %v648_v63 = vrot.slane %v1809_v25, %v2028_v7  ;;  %v668_v9 = vmul.f32 %v661_v59, %v2199_v61 }
  0xb7   : > { %v255_v14 = vmul.f32 %v248_v1, %v2222_v13  ;;  %v256_v15 = vmul.f32 %v252_v2, %v2218_v12  ;;  %v1806_v1 = vld [vmem:[%s2695_s3 + $0x20] ss:$8 sm:$0x3]  ;;  %v669_v2 = vmul.f32 %v665_v58, %v2203_v62  ;;  %v627_v10 = vrot.slane %v1808_v34, %v2026_v6 }
  0xb8   : > { %v652_v11 = vmul.f32 %v648_v63, %v2222_v13  ;;  %v614_v62 = vrot.slane %v1807_v43, %v2028_v7  ;;  %v586_v61 = vrot.slane %v1806_v1, %v2026_v6 }
  0xb9   : > { %v213_v22 = vpop.permute.xlu1 %212  ;;  %870 = vmatprep.subr.mxu0 %v256_v15  ;;  %v211_v23 = vpop.permute.xlu0 %210  ;;  %v590_v15 = vrot.slane %v1806_v1, %v2028_v7 }
  0xba   : > { %v2239_v28 = vsel %vm2697_vm14, %v211_v23, %v213_v22  ;;  %v2243_v29 = vsel %vm2697_vm14, %v213_v22, %v211_v23  ;;  %871 = vmatpush1.msra.mxu0 %v255_v14  ;;  %vm2698_vm14 = vcmp.lt.s32.totalorder %v2024_v5, 120  ;;  %v610_v14 = vrot.slane %v1807_v43, %v2026_v6 }
  0xbb   : > { %v231_v31 = vmul.f32 %v224_v18, %v2243_v29  ;;  %v232_v32 = vmul.f32 %v228_v19, %v2239_v28  ;;  %v651_v18 = vmul.f32 %v644_v44, %v2218_v12  ;;  %v635_v13 = vmul.f32 %v631_v53, %v2243_v29  ;;  %v774_v29 = vld [vmem:[%s2693_s1] sm:$0xff] }
  0xbc   : > { %v634_v12 = vmul.f32 %v627_v10, %v2239_v28  ;;  %v776_v28 = vld [vmem:[%s2693_s1 + $0x10] sm:$0xff] }
  0xbd   : > { %872 = vmatprep.subr.mxu0 %v232_v32  ;;  %v600_v54 = vpop.permute.xlu1 %599  ;;  %v598_v55 = vpop.permute.xlu0 %597 }
  0xbe   : > { %873 = vmatpush1.msra.mxu0 %v231_v31  ;;  %v603_v19 = vsel %vm2699_vm15, %v600_v54, %v598_v55  ;;  %v602_v21 = vsel %vm2699_vm15, %v598_v55, %v600_v54  ;;  %v777_v31 = vld [vmem:[%s2693_s1 + $0x18] sm:$0xff] }
  0xbf   : > { %884 = vmatprep.subr.mxu0 %v771_v37  ;;  %v618_v23 = vmul.f32 %v614_v62, %v603_v19  ;;  %v617_v27 = vmul.f32 %v610_v14, %v602_v21 }
  0xc0   : > { %885 = vmatpush2.msra.mxu0 %v770_v39 }
  0xc1   : > { %886 = vmatprep.subr.mxu0 %v754_v42  ;;  %v576_v3 = vpop.permute.xlu1 %575  ;;  %v574_v52 = vpop.permute.xlu0 %573 }
  0xc2   : > { %887 = vmatpush2.msra.mxu0 %v753_v46  ;;  %v579_v20 = vsel %vm2698_vm14, %v576_v3, %v574_v52  ;;  %v578_v22 = vsel %vm2698_vm14, %v574_v52, %v576_v3 }
  0xc3   : > { %888 = vmatprep.subr.mxu0 %v737_v47  ;;  %v594_v24 = vmul.f32 %v590_v15, %v579_v20  ;;  %v593_v30 = vmul.f32 %v586_v61, %v578_v22 }
  0xc4   : > { %889 = vmatpush2.msra.mxu0 %v736_v49 }
  0xc5   : > { %890 = vmatprep.subr.mxu0 %v720_v50 }
  0xc6   : > { %891 = vmatpush2.msra.mxu0 %v719_v26 }
  0xc7   : > { %892 = vmatprep.subr.mxu0 %v703_v57 }
  0xc8   : > { %893 = vmatpush2.msra.mxu0 %v702_v35 }
  0xc9   : > { %894 = vmatprep.subr.mxu0 %v686_v60 }
  0xca   : > { %895 = vmatpush2.msra.mxu0 %v685_v0 }
  0xcb   : > { %896 = vmatprep.subr.mxu0 %v669_v2 }
  0xcc   : > { %897 = vmatpush2.msra.mxu0 %v668_v9 }
  0xcd   : > { %898 = vmatprep.subr.mxu0 %v652_v11 }
  0xce   : > { %899 = vmatpush2.msra.mxu0 %v651_v18 }
  0xcf   : > { %900 = vmatprep.subr.mxu0 %v635_v13 }
  0xd0   : > { %901 = vmatpush2.msra.mxu0 %v634_v12 }
  0xd1   : > { %902 = vmatprep.subr.mxu0 %v618_v23 }
  0xd2   : > { %903 = vmatpush2.msra.mxu0 %v617_v27 }
  0xd3   : > { %904 = vmatprep.subr.mxu0 %v594_v24 }
  0xd4   : > { %905 = vmatpush2.msra.mxu0 %v593_v30 }
  0xd5   : > { %907 = vmatmul.mubr.f32.vlgmr.msra.gmra.mxu0 %v774_v29 }
  0xd6   : > { %912 = vmatprep.mubr.f32.mxu0 %v777_v31 }
  0xd9   : > { %913 = vmatmul.mubr.f32.gmra.mxu0 %v776_v28 }
 0x195   : > { %v908_v32 = vpop.f32.mrf.mxu0 }
 0x196   : > { %v942_v37 = vmul.f32 %v908_v32, %v908_v32 }
 0x197   : > { %v910_v33 = vpop.f32.mrf.mxu0 }
 0x198   : > { %v938_v36 = vadd.f32 %v910_v33, %v908_v32  ;;  %v943_v38 = vmul.f32 %v910_v33, %v910_v33 }
 0x199   : > { %v914_v39 = vpop.f32.mrf.mxu0 }
 0x19a   : > { %939 = vadd.xlane.f32.xlu0 %v938_v36  ;;  %v944_v40 = vadd.f32 %v943_v38, %v942_v37  ;;  %v923_v46 = vmul.f32 %v914_v39, %v914_v39  ;;  %v1511_v38 = vld [vmem:[%s2694_s2 + $0x8] sm:$0xff] }
 0x19b   : > { %v916_v41 = vpop.f32.mrf.mxu0  ;;  %1642 = vmatprep.mubr.f32.mxu1 %v1511_v38 }
 0x19c   : > { %v924_v42 = vmul.f32 %v916_v41, %v916_v41  ;;  %945 = vadd.xlane.f32.xlu1 %v944_v40  ;;  %v919_v45 = vadd.f32 %v916_v41, %v914_v39 }
 0x19e   : > { %920 = vadd.xlane.f32.xlu0 %v919_v45  ;;  %v925_v8 = vadd.f32 %v924_v42, %v923_v46 }
 0x1a2   : > { %926 = vadd.xlane.f32.xlu0 %v925_v8 }
 0x223   : > { %v940_v4 = vpop.xlane.xlu0 %939 }
 0x224   : > { %v941_v47 = vmul.f32 0.00390625, %v940_v4 }
 0x225   : > { %v946_v48 = vpop.xlane.xlu1 %945 }
 0x226   : > { %v947_v49 = vmul.f32 0.00390625, %v946_v48  ;;  %v948_v17 = vmul.f32 %v941_v47, %v941_v47  ;;  %v951_v59 = vsub.f32 %v908_v32, %v941_v47  ;;  %v952_v34 = vsub.f32 %v910_v33, %v941_v47  ;;  %v1829_v48 = vld [vmem:[%s2695_s3 + $0x16] ss:$8 sm:$0x3] }
 0x227   : > { %v921_v16 = vpop.xlane.xlu0 %920 }
 0x228   : > { %v949_v50 = vsub.f32 %v947_v49, %v948_v17  ;;  %v922_v51 = vmul.f32 0.00390625, %v921_v16  ;;  %v1289_v16 = vrot.slane %v1829_v48, %v2026_v6 }
 0x22a   : > { %v950_v54 = vmax.f32 %v949_v50, 0.0  ;;  %v929_v56 = vmul.f32 %v922_v51, %v922_v51  ;;  %v932_v1 = vsub.f32 %v914_v39, %v922_v51  ;;  %v933_v2 = vsub.f32 %v916_v41, %v922_v51  ;;  %v1830_v39 = vld [vmem:[%s2695_s3 + $0x17] ss:$8 sm:$0x3] }
 0x22b   : > { %v927_v55 = vpop.xlane.xlu0 %926  ;;  %v1315_v40 = vrot.slane %v1830_v39, %v2028_v7  ;;  %v1311_v41 = vrot.slane %v1830_v39, %v2026_v6  ;;  %v1293_v50 = vrot.slane %v1829_v48, %v2028_v7  ;;  %v1828_v51 = vld [vmem:[%s2695_s3 + $0x14] ss:$8 sm:$0x3] }
 0x22c   : > { %v953_v26 = vadd.f32 1e-05, %v950_v54  ;;  %v928_v25 = vmul.f32 0.00390625, %v927_v55 }
 0x22e   : > { %1871 = vrsqrt.f32 %v953_v26  ;;  %v930_v57 = vsub.f32 %v928_v25, %v929_v56 }
 0x230   : > { %v931_v58 = vmax.f32 %v930_v57, 0.0 }
 0x232   : > { %v934_v35 = vadd.f32 1e-05, %v931_v58  ;;  %v1265_v58 = vrot.slane %v1828_v51, %v2026_v6 }
 0x234   : > { %1873 = vrsqrt.f32 %v934_v35  ;;  %v1269_v35 = vrot.slane %v1828_v51, %v2028_v7 }
 0x23b   : > { %v1872_v60 = vpop.eup %1871 }
 0x23c   : > { %v955_v63 = vmul.f32 %v1872_v60, %v951_v59  ;;  %v956_v0 = vmul.f32 %v1872_v60, %v952_v34  ;;  %v1827_v59 = vld [vmem:[%s2695_s3 + $0x13] ss:$8 sm:$0x3] }
 0x23e   : > { %v959_v44 = vmul.f32 0.01, %v955_v63  ;;  %v960_v43 = vmul.f32 0.01, %v956_v0  ;;  %vm957_vm14 = vcmp.ge.f32.partialorder %v955_v63, 0.0  ;;  %vm958_vm15 = vcmp.ge.f32.partialorder %v956_v0, 0.0 }
 0x240   : > { %v961_v9 = vsel %vm957_vm14, %v955_v63, %v959_v44  ;;  %v962_v10 = vsel %vm958_vm15, %v956_v0, %v960_v43 }
 0x241   : > { %v1874_v53 = vpop.eup %1873 }
 0x242   : > { %v936_v3 = vmul.f32 %v1874_v53, %v932_v1  ;;  %v937_v52 = vmul.f32 %v1874_v53, %v933_v2  ;;  %v1243_v1 = vrot.slane %v1827_v59, %v2026_v6  ;;  %v1247_v2 = vrot.slane %v1827_v59, %v2028_v7  ;;  %v1826_v53 = vld [vmem:[%s2695_s3 + $0x12] ss:$8 sm:$0x3] }
 0x244   : > { %v963_v11 = vadd.f32 %v961_v9, %v936_v3  ;;  %v964_v14 = vadd.f32 %v962_v10, %v937_v52 }
 0x246   : > { %vm965_vm13 = vcmp.ge.f32.partialorder %v963_v11, 0.0  ;;  %vm966_vm12 = vcmp.ge.f32.partialorder %v964_v14, 0.0  ;;  %v967_v62 = vmul.f32 0.01, %v963_v11  ;;  %v968_v15 = vmul.f32 0.01, %v964_v14 }
 0x248   : > { %v969_v18 = vsel %vm965_vm13, %v963_v11, %v967_v62  ;;  %v970_v19 = vsel %vm966_vm12, %v964_v14, %v968_v15  ;;  %v1221_v62 = vrot.slane %v1826_v53, %v2026_v6  ;;  %v1225_v15 = vrot.slane %v1826_v53, %v2028_v7 }
 0x249   : > { %v971_v61 = vadd.f32 %v970_v19, %v969_v18  ;;  %v975_v20 = vmul.f32 %v969_v18, %v969_v18  ;;  %v976_v13 = vmul.f32 %v970_v19, %v970_v19 }
 0x24b   : > { %972 = vadd.xlane.f32.xlu1 %v971_v61  ;;  %v977_v21 = vadd.f32 %v976_v13, %v975_v20 }
 0x24d   : > { %978 = vadd.xlane.f32.xlu0 %v977_v21 }
 0x2d4   : > { %v973_v22 = vpop.xlane.xlu1 %972 }
 0x2d5   : > { %v974_v12 = vmul.f32 0.00390625, %v973_v22 }
 0x2d6   : > { %v979_v23 = vpop.xlane.xlu0 %978 }
 0x2d7   : > { %v980_v24 = vmul.f32 0.00390625, %v979_v23  ;;  %v981_v27 = vmul.f32 %v974_v12, %v974_v12  ;;  %v984_v28 = vsub.f32 %v969_v18, %v974_v12  ;;  %v985_v32 = vsub.f32 %v970_v19, %v974_v12  ;;  %v1825_v18 = vld [vmem:[%s2695_s3 + $0x11] ss:$8 sm:$0x3] }
 0x2d8   : > { %v1199_v12 = vrot.slane %v1825_v18, %v2026_v6  ;;  %v1203_v23 = vrot.slane %v1825_v18, %v2028_v7 }
 0x2d9   : > { %v982_v30 = vsub.f32 %v980_v24, %v981_v27  ;;  %v1824_v24 = vld [vmem:[%s2695_s3 + $0x10] ss:$8 sm:$0x3] }
 0x2db   : > { %v983_v29 = vmax.f32 %v982_v30, 0.0 }
 0x2dd   : > { %v986_v31 = vadd.f32 1e-05, %v983_v29 }
 0x2df   : > { %1875 = vrsqrt.f32 %v986_v31 }
 0x2ec   : > { %v1876_v33 = vpop.eup %1875 }
 0x2ed   : > { %v2328_v36 = vmul.f32 %v1876_v33, %v984_v28  ;;  %v2330_v37 = vmul.f32 %v1876_v33, %v985_v32  ;;  %v1177_v33 = vrot.slane %v1824_v24, %v2026_v6 }
 0x2ef   : > { %1302 = vrot.lane.b32.xlu0 %v2330_v37, %s1892_s22  ;;  %1300 = vrot.lane.b32.xlu1 %v2328_v36, %s1892_s22 }
 0x2f3   : > { %1254 = vrot.lane.b32.xlu0 %v2328_v36, %s1893_s23  ;;  %1278 = vrot.lane.b32.xlu1 %v2328_v36, %s1891_s21 }
 0x2f7   : > { %1232 = vrot.lane.b32.xlu0 %v2328_v36, %s1894_s24  ;;  %1280 = vrot.lane.b32.xlu1 %v2330_v37, %s1891_s21 }
 0x2fb   : > { %1210 = vrot.lane.b32.xlu0 %v2328_v36, %s1895_s25  ;;  %1256 = vrot.lane.b32.xlu1 %v2330_v37, %s1893_s23 }
 0x2ff   : > { %1188 = vrot.lane.b32.xlu0 %v2328_v36, %s1896_s26  ;;  %1234 = vrot.lane.b32.xlu1 %v2330_v37, %s1894_s24 }
 0x303   : > { %1166 = vrot.lane.b32.xlu0 %v2328_v36, %s1897_s27  ;;  %1212 = vrot.lane.b32.xlu1 %v2330_v37, %s1895_s25 }
 0x307   : > { %1144 = vrot.lane.b32.xlu0 %v2328_v36, %s1898_s28  ;;  %1190 = vrot.lane.b32.xlu1 %v2330_v37, %s1896_s26 }
 0x30b   : > { %1122 = vrot.lane.b32.xlu0 %v2328_v36, %s1899_s29  ;;  %1168 = vrot.lane.b32.xlu1 %v2330_v37, %s1897_s27 }
 0x30f   : > { %1100 = vrot.lane.b32.xlu0 %v2328_v36, %s1900_s30  ;;  %1146 = vrot.lane.b32.xlu1 %v2330_v37, %s1898_s28 }
 0x313   : > { %1078 = vrot.lane.b32.xlu0 %v2328_v36, %s1901_s5  ;;  %1124 = vrot.lane.b32.xlu1 %v2330_v37, %s1899_s29 }
 0x317   : > { %1056 = vrot.lane.b32.xlu0 %v2328_v36, %s1902_s6  ;;  %1102 = vrot.lane.b32.xlu1 %v2330_v37, %s1900_s30 }
 0x31b   : > { %1034 = vrot.lane.b32.xlu0 %v2328_v36, %s1903_s7  ;;  %1080 = vrot.lane.b32.xlu1 %v2330_v37, %s1901_s5 }
 0x31f   : > { %1012 = vrot.lane.b32.xlu0 %v2328_v36, %s1904_s8  ;;  %1058 = vrot.lane.b32.xlu1 %v2330_v37, %s1902_s6 }
 0x323   : > { %990 = vrot.lane.b32.xlu0 %v2328_v36, %s1905_s9  ;;  %1036 = vrot.lane.b32.xlu1 %v2330_v37, %s1903_s7 }
 0x327   : > { %1344 = vrot.lane.b32.xlu0 %v2328_v36, %s1906_s10  ;;  %1014 = vrot.lane.b32.xlu1 %v2330_v37, %s1904_s8 }
 0x32b   : > { %1322 = vrot.lane.b32.xlu0 %v2328_v36, %s1907_s11  ;;  %992 = vrot.lane.b32.xlu1 %v2330_v37, %s1905_s9 }
 0x32f   : > { %1346 = vrot.lane.b32.xlu1 %v2330_v37, %s1906_s10 }
 0x333   : > { %1324 = vrot.lane.b32.xlu1 %v2330_v37, %s1907_s11  ;;  %s197_s11 = scalar_lea.vmem %s2696_s4, %s1844_s17 }
 0x361   : > { %v1303_v42 = vpop.permute.xlu0 %1302  ;;  %v1301_v45 = vpop.permute.xlu1 %1300 }
 0x362   : > { %v1304_v46 = vsel %vm553_vm1, %v1301_v45, %v1303_v42  ;;  %v1305_v8 = vsel %vm553_vm1, %v1303_v42, %v1301_v45 }
 0x363   : > { %v1319_v4 = vmul.f32 %v1315_v40, %v1305_v8  ;;  %v1318_v47 = vmul.f32 %v1311_v41, %v1304_v46 }
 0x365   : > { %v1255_v49 = vpop.permute.xlu0 %1254  ;;  %1578 = vmatprep.subr.mxu1 %v1319_v4  ;;  %v1279_v17 = vpop.permute.xlu1 %1278  ;;  %v1822_v4 = vld [vmem:[%s2695_s3 + $0x6] ss:$8 sm:$0x3] }
 0x366   : > { %1579 = vmatpush1.msra.mxu1 %v1318_v47  ;;  %v1133_v51 = vrot.slane %v1822_v4, %v2026_v6 }
 0x369   : > { %v1233_v54 = vpop.permute.xlu0 %1232  ;;  %v1281_v55 = vpop.permute.xlu1 %1280 }
 0x36a   : > { %v1282_v26 = vsel %vm529_vm0, %v1279_v17, %v1281_v55  ;;  %v1283_v56 = vsel %vm529_vm0, %v1281_v55, %v1279_v17  ;;  %v1821_v55 = vld [vmem:[%s2695_s3 + $0x5] ss:$8 sm:$0x3]  ;;  %vm2702_vm0 = vcmp.lt.s32.totalorder %v2024_v5, 71 }
 0x36b   : > { %v1296_v25 = vmul.f32 %v1289_v16, %v1282_v26  ;;  %v1297_v57 = vmul.f32 %v1293_v50, %v1283_v56  ;;  %v1111_v59 = vrot.slane %v1821_v55, %v2026_v6  ;;  %vm2703_vm1 = vmmov %vm2702_vm0 }
 0x36d   : > { %v1211_v34 = vpop.permute.xlu0 %1210  ;;  %1580 = vmatprep.subr.mxu1 %v1297_v57  ;;  %v1257_v60 = vpop.permute.xlu1 %1256 }
 0x36e   : > { %v1258_v63 = vsel %vm503_vm2, %v1255_v49, %v1257_v60  ;;  %v1259_v0 = vsel %vm503_vm2, %v1257_v60, %v1255_v49  ;;  %1581 = vmatpush1.msra.mxu1 %v1296_v25  ;;  %v1820_v60 = vld [vmem:[%s2695_s3 + $0x4] ss:$8 sm:$0x3]  ;;  %vm2704_vm2 = vcmp.lt.s32.totalorder %v2024_v5, 72 }
 0x36f   : > { %v1272_v44 = vmul.f32 %v1265_v58, %v1259_v0  ;;  %v1273_v43 = vmul.f32 %v1269_v35, %v1258_v63  ;;  %1582 = vmatprep.subr.mxu1 %v2330_v37  ;;  %v1823_v37 = vld [vmem:[%s2695_s3 + $0x7] ss:$8 sm:$0x3]  ;;  %v1089_v53 = vrot.slane %v1820_v60, %v2026_v6 }
 0x370   : > { %1583 = vmatpush1.msra.mxu1 %v2328_v36  ;;  %v1181_v36 = vrot.slane %v1824_v24, %v2028_v7  ;;  %v1155_v46 = vrot.slane %v1823_v37, %v2026_v6  ;;  %v1159_v8 = vrot.slane %v1823_v37, %v2028_v7 }
 0x371   : > { %v1189_v3 = vpop.permute.xlu0 %1188  ;;  %1584 = vmatprep.subr.mxu1 %v1273_v43  ;;  %v1235_v52 = vpop.permute.xlu1 %1234 }
 0x372   : > { %v1236_v9 = vsel %vm479_vm3, %v1233_v54, %v1235_v52  ;;  %v1237_v10 = vsel %vm479_vm3, %v1235_v52, %v1233_v54  ;;  %1585 = vmatpush1.msra.mxu1 %v1272_v44  ;;  %v1137_v54 = vrot.slane %v1822_v4, %v2028_v7  ;;  %v1819_v52 = vld [vmem:[%s2695_s3 + $0x3] ss:$8 sm:$0x3]  ;;  %vm2705_vm3 = vmmov %vm2704_vm2 }
 0x373   : > { %v1250_v11 = vmul.f32 %v1243_v1, %v1237_v10  ;;  %v1251_v14 = vmul.f32 %v1247_v2, %v1236_v9  ;;  %v1071_v18 = vrot.slane %v1819_v52, %v2028_v7 }
 0x375   : > { %v1167_v19 = vpop.permute.xlu0 %1166  ;;  %1586 = vmatprep.subr.mxu1 %v1251_v14  ;;  %v1213_v61 = vpop.permute.xlu1 %1212 }
 0x376   : > { %v1214_v20 = vsel %vm455_vm4, %v1211_v34, %v1213_v61  ;;  %v1215_v13 = vsel %vm455_vm4, %v1213_v61, %v1211_v34  ;;  %1587 = vmatpush1.msra.mxu1 %v1250_v11  ;;  %v1115_v34 = vrot.slane %v1821_v55, %v2028_v7  ;;  %vm2706_vm4 = vcmp.lt.s32.totalorder %v2024_v5, 73 }
 0x377   : > { %v1228_v21 = vmul.f32 %v1221_v62, %v1215_v13  ;;  %v1229_v22 = vmul.f32 %v1225_v15, %v1214_v20  ;;  %v1067_v15 = vrot.slane %v1819_v52, %v2026_v6 }
 0x379   : > { %v1145_v27 = vpop.permute.xlu0 %1144  ;;  %1588 = vmatprep.subr.mxu1 %v1229_v22  ;;  %v1191_v30 = vpop.permute.xlu1 %1190 }
 0x37a   : > { %v1192_v29 = vsel %vm431_vm5, %v1189_v3, %v1191_v30  ;;  %v1193_v31 = vsel %vm431_vm5, %v1191_v30, %v1189_v3  ;;  %1589 = vmatpush1.msra.mxu1 %v1228_v21  ;;  %v1093_v3 = vrot.slane %v1820_v60, %v2028_v7  ;;  %vm2707_vm5 = vmmov %vm2706_vm4 }
 0x37b   : > { %v1206_v28 = vmul.f32 %v1199_v12, %v1193_v31  ;;  %v1207_v32 = vmul.f32 %v1203_v23, %v1192_v29 }
 0x37d   : > { %v1123_v38 = vpop.permute.xlu0 %1122  ;;  %1590 = vmatprep.subr.mxu1 %v1207_v32  ;;  %v1169_v39 = vpop.permute.xlu1 %1168 }
 0x37e   : > { %v2469_v40 = vsel %vm407_vm6, %v1167_v19, %v1169_v39  ;;  %v2473_v41 = vsel %vm407_vm6, %v1169_v39, %v1167_v19  ;;  %1591 = vmatpush1.msra.mxu1 %v1206_v28  ;;  %v1818_v19 = vld [vmem:[%s2695_s3 + $0x2] ss:$8 sm:$0x3]  ;;  %vm2708_vm6 = vcmp.lt.s32.totalorder %v2024_v5, 119 }
 0x37f   : > { %v1184_v42 = vmul.f32 %v1177_v33, %v2473_v41  ;;  %v1185_v45 = vmul.f32 %v1181_v36, %v2469_v40  ;;  %v1045_v23 = vrot.slane %v1818_v19, %v2026_v6  ;;  %v1049_v24 = vrot.slane %v1818_v19, %v2028_v7 }
 0x381   : > { %v1101_v47 = vpop.permute.xlu0 %1100  ;;  %1592 = vmatprep.subr.mxu1 %v1185_v45  ;;  %v1147_v48 = vpop.permute.xlu1 %1146 }
 0x382   : > { %v2484_v49 = vsel %vm383_vm7, %v1145_v27, %v1147_v48  ;;  %v2488_v17 = vsel %vm383_vm7, %v1147_v48, %v1145_v27  ;;  %1593 = vmatpush1.msra.mxu1 %v1184_v42  ;;  %v1817_v27 = vld [vmem:[%s2695_s3 + $0x1] ss:$8 sm:$0x3]  ;;  %v1841_v42 = vld [vmem:[%s2695_s3 + $0x32] ss:$8 sm:$0x3]  ;;  %vm2709_vm7 = vmmov %vm2708_vm6 }
 0x383   : > { %v1162_v16 = vmul.f32 %v1155_v46, %v2488_v17  ;;  %v1163_v50 = vmul.f32 %v1159_v8, %v2484_v49  ;;  %v1023_v36 = vrot.slane %v1817_v27, %v2026_v6  ;;  %v1027_v37 = vrot.slane %v1817_v27, %v2028_v7 }
 0x384   : > { %v1499_v55 = vrot.slane %v1841_v42, %v2026_v6 }
 0x385   : > { %v1079_v26 = vpop.permute.xlu0 %1078  ;;  %1594 = vmatprep.subr.mxu1 %v1163_v50  ;;  %v1125_v56 = vpop.permute.xlu1 %1124  ;;  %v1503_v50 = vrot.slane %v1841_v42, %v2028_v7 }
 0x386   : > { %v2499_v25 = vsel %vm359_vm8, %v1123_v38, %v1125_v56  ;;  %v2503_v57 = vsel %vm359_vm8, %v1125_v56, %v1123_v38  ;;  %1595 = vmatpush1.msra.mxu1 %v1162_v16  ;;  %v996_v38 = vld [vmem:[%s2695_s3] ss:$8 sm:$0x3]  ;;  %v1840_v16 = vld [vmem:[%s2695_s3 + $0x31] ss:$8 sm:$0x3] }
 0x387   : > { %v1140_v58 = vmul.f32 %v1133_v51, %v2503_v57  ;;  %v1141_v35 = vmul.f32 %v1137_v54, %v2499_v25  ;;  %v1005_v48 = vrot.slane %v996_v38, %v2028_v7  ;;  %v1483_v60 = vrot.slane %v1840_v16, %v2026_v6 }
 0x388   : > { %vm2710_vm8 = vcmp.lt.s32.totalorder %v2024_v5, 120  ;;  %v1512_v5 = vld [vmem:[%s2694_s2 + $0x10] sm:$0xff] }
 0x389   : > { %1596 = vmatprep.subr.mxu1 %v1141_v35  ;;  %v1103_v63 = vpop.permute.xlu1 %1102  ;;  %v1057_v43 = vpop.permute.xlu0 %1056  ;;  %v1487_v35 = vrot.slane %v1840_v16, %v2028_v7 }
 0x38a   : > { %v2514_v0 = vsel %vm335_vm9, %v1101_v47, %v1103_v63  ;;  %v2518_v44 = vsel %vm335_vm9, %v1103_v63, %v1101_v47  ;;  %1597 = vmatpush1.msra.mxu1 %v1140_v58  ;;  %v1001_v47 = vrot.slane %v996_v38, %v2026_v6  ;;  %v1838_v63 = vld [vmem:[%s2695_s3 + $0x27] ss:$8 sm:$0x3]  ;;  %vm2711_vm9 = vmmov %vm2710_vm8 }
 0x38b   : > { %v1118_v1 = vmul.f32 %v1111_v59, %v2518_v44  ;;  %v1119_v2 = vmul.f32 %v1115_v34, %v2514_v0  ;;  %v1491_v52 = vmul.f32 %v1487_v35, %v2488_v17 }
 0x38d   : > { %1598 = vmatprep.subr.mxu1 %v1119_v2  ;;  %v1081_v9 = vpop.permute.xlu1 %1080  ;;  %v1035_v61 = vpop.permute.xlu0 %1034  ;;  %v1506_v2 = vmul.f32 %v1499_v55, %v2469_v40  ;;  %v1836_v40 = vld [vmem:[%s2695_s3 + $0x25] ss:$8 sm:$0x3] }
 0x38e   : > { %v2529_v10 = vsel %vm311_vm10, %v1079_v26, %v1081_v9  ;;  %v2533_v11 = vsel %vm311_vm10, %v1081_v9, %v1079_v26  ;;  %1599 = vmatpush1.msra.mxu1 %v1118_v1  ;;  %v1839_v26 = vld [vmem:[%s2695_s3 + $0x30] ss:$8 sm:$0x3]  ;;  %v1455_v9 = vrot.slane %v1838_v63, %v2028_v7 }
 0x38f   : > { %v1096_v14 = vmul.f32 %v1089_v53, %v2533_v11  ;;  %v1097_v62 = vmul.f32 %v1093_v3, %v2529_v10  ;;  %v1471_v1 = vrot.slane %v1839_v26, %v2028_v7  ;;  %v1467_v53 = vrot.slane %v1839_v26, %v2026_v6  ;;  %v1837_v3 = vld [vmem:[%s2695_s3 + $0x26] ss:$8 sm:$0x3] }
 0x390   : > { %v1435_v17 = vrot.slane %v1837_v3, %v2026_v6  ;;  %v1459_v19 = vmul.f32 %v1455_v9, %v2518_v44 }
 0x391   : > { %1600 = vmatprep.subr.mxu1 %v1097_v62  ;;  %v1059_v20 = vpop.permute.xlu1 %1058  ;;  %v1013_v28 = vpop.permute.xlu0 %1012  ;;  %v1475_v62 = vmul.f32 %v1471_v1, %v2503_v57  ;;  %v1419_v57 = vrot.slane %v1836_v40, %v2026_v6 }
 0x392   : > { %v2544_v13 = vsel %vm287_vm11, %v1057_v43, %v1059_v20  ;;  %v2548_v21 = vsel %vm287_vm11, %v1059_v20, %v1057_v43  ;;  %1601 = vmatpush1.msra.mxu1 %v1096_v14  ;;  %v1507_v43 = vmul.f32 %v1503_v50, %v2473_v41  ;;  %v1490_v14 = vmul.f32 %v1483_v60, %v2484_v49  ;;  %v1835_v49 = vld [vmem:[%s2695_s3 + $0x24] ss:$8 sm:$0x3] }
 0x393   : > { %v1074_v22 = vmul.f32 %v1067_v15, %v2548_v21  ;;  %v1075_v12 = vmul.f32 %v1071_v18, %v2544_v13  ;;  %v1451_v41 = vrot.slane %v1838_v63, %v2026_v6  ;;  %v1439_v15 = vrot.slane %v1837_v3, %v2028_v7 }
 0x394   : > { %v1474_v18 = vmul.f32 %v1467_v53, %v2499_v25  ;;  %v1834_v25 = vld [vmem:[%s2695_s3 + $0x23] ss:$8 sm:$0x3]  ;;  %v1442_v44 = vmul.f32 %v1435_v17, %v2529_v10  ;;  %v1832_v10 = vld [vmem:[%s2695_s3 + $0x21] ss:$8 sm:$0x3] }
 0x395   : > { %1602 = vmatprep.subr.mxu1 %v1075_v12  ;;  %v1037_v30 = vpop.permute.xlu1 %1036  ;;  %v991_v51 = vpop.permute.xlu0 %990  ;;  %v1458_v20 = vmul.f32 %v1451_v41, %v2514_v0  ;;  %v1407_v12 = vrot.slane %v1835_v49, %v2028_v7  ;;  %v1833_v0 = vld [vmem:[%s2695_s3 + $0x22] ss:$8 sm:$0x3] }
 0x396   : > { %v2559_v29 = vsel %vm2702_vm0, %v1035_v61, %v1037_v30  ;;  %v2563_v31 = vsel %vm2703_vm1, %v1037_v30, %v1035_v61  ;;  %1603 = vmatpush1.msra.mxu1 %v1074_v22  ;;  %v1423_v61 = vrot.slane %v1836_v40, %v2028_v7  ;;  %v1443_v22 = vmul.f32 %v1439_v15, %v2533_v11 }
 0x397   : > { %v1052_v32 = vmul.f32 %v1045_v23, %v2563_v31  ;;  %v1053_v33 = vmul.f32 %v1049_v24, %v2559_v29  ;;  %v1403_v24 = vrot.slane %v1835_v49, %v2026_v6  ;;  %v1426_v11 = vmul.f32 %v1419_v57, %v2544_v13  ;;  %v1831_v13 = vld [vmem:[%s2695_s3 + $0x20] ss:$8 sm:$0x3] }
 0x398   : > { %v1427_v27 = vmul.f32 %v1423_v61, %v2548_v21  ;;  %v1333_v50 = vrot.slane %v1831_v13, %v2026_v6 }
 0x399   : > { %1604 = vmatprep.subr.mxu1 %v1053_v33  ;;  %v1015_v39 = vpop.permute.xlu1 %1014  ;;  %v1345_v30 = vpop.permute.xlu0 %1344  ;;  %v1411_v33 = vmul.f32 %v1407_v12, %v2563_v31  ;;  %v1410_v21 = vmul.f32 %v1403_v24, %v2559_v29 }
 0x39a   : > { %v2577_v45 = vsel %vm2704_vm2, %v1013_v28, %v1015_v39  ;;  %v2581_v46 = vsel %vm2705_vm3, %v1015_v39, %v1013_v28  ;;  %1605 = vmatpush1.msra.mxu1 %v1052_v32  ;;  %v1391_v28 = vrot.slane %v1834_v25, %v2028_v7  ;;  %v1387_v32 = vrot.slane %v1834_v25, %v2026_v6 }
 0x39b   : > { %v1030_v8 = vmul.f32 %v1023_v36, %v2581_v46  ;;  %v1031_v4 = vmul.f32 %v1027_v37, %v2577_v45  ;;  %v1375_v36 = vrot.slane %v1833_v0, %v2028_v7  ;;  %v1371_v37 = vrot.slane %v1833_v0, %v2026_v6 }
 0x39c   : > { %v1395_v38 = vmul.f32 %v1391_v28, %v2581_v46  ;;  %v1359_v39 = vrot.slane %v1832_v10, %v2028_v7  ;;  %v1394_v31 = vmul.f32 %v1387_v32, %v2577_v45  ;;  %v1337_v46 = vrot.slane %v1831_v13, %v2028_v7  ;;  %v1510_v7 = vld [vmem:[%s2694_s2] sm:$0xff] }
 0x39d   : > { %1606 = vmatprep.subr.mxu1 %v1031_v4  ;;  %v993_v54 = vpop.permute.xlu1 %992  ;;  %v1323_v4 = vpop.permute.xlu0 %1322 }
 0x39e   : > { %v2597_v56 = vsel %vm2706_vm4, %v991_v51, %v993_v54  ;;  %v2601_v58 = vsel %vm2707_vm5, %v993_v54, %v991_v51  ;;  %1607 = vmatpush1.msra.mxu1 %v1030_v8  ;;  %v1355_v8 = vrot.slane %v1832_v10, %v2026_v6  ;;  %v1513_v6 = vld [vmem:[%s2694_s2 + $0x18] sm:$0xff] }
 0x39f   : > { %v1008_v59 = vmul.f32 %v1001_v47, %v2601_v58  ;;  %v1009_v34 = vmul.f32 %v1005_v48, %v2597_v56  ;;  %v1379_v47 = vmul.f32 %v1375_v36, %v2601_v58  ;;  %v1378_v16 = vmul.f32 %v1371_v37, %v2597_v56 }
 0x3a1   : > { %1608 = vmatprep.subr.mxu1 %v1009_v34  ;;  %v1347_v23 = vpop.permute.xlu1 %1346 }
 0x3a2   : > { %1609 = vmatpush1.msra.mxu1 %v1008_v59  ;;  %v1349_v29 = vsel %vm2708_vm6, %v1347_v23, %v1345_v30  ;;  %v1348_v48 = vsel %vm2709_vm7, %v1345_v30, %v1347_v23 }
 0x3a3   : > { %1620 = vmatprep.subr.mxu1 %v1507_v43  ;;  %v1363_v51 = vmul.f32 %v1359_v39, %v1349_v29  ;;  %v1362_v55 = vmul.f32 %v1355_v8, %v1348_v48 }
 0x3a4   : > { %1621 = vmatpush2.msra.mxu1 %v1506_v2 }
 0x3a5   : > { %1622 = vmatprep.subr.mxu1 %v1491_v52  ;;  %v1325_v42 = vpop.permute.xlu1 %1324 }
 0x3a6   : > { %1623 = vmatpush2.msra.mxu1 %v1490_v14  ;;  %v1327_v45 = vsel %vm2710_vm8, %v1325_v42, %v1323_v4  ;;  %v1326_v54 = vsel %vm2711_vm9, %v1323_v4, %v1325_v42 }
 0x3a7   : > { %1624 = vmatprep.subr.mxu1 %v1475_v62  ;;  %v1341_v26 = vmul.f32 %v1337_v46, %v1327_v45  ;;  %v1340_v58 = vmul.f32 %v1333_v50, %v1326_v54 }
 0x3a8   : > { %1625 = vmatpush2.msra.mxu1 %v1474_v18 }
 0x3a9   : > { %1626 = vmatprep.subr.mxu1 %v1459_v19 }
 0x3aa   : > { %1627 = vmatpush2.msra.mxu1 %v1458_v20 }
 0x3ab   : > { %1628 = vmatprep.subr.mxu1 %v1443_v22 }
 0x3ac   : > { %1629 = vmatpush2.msra.mxu1 %v1442_v44 }
 0x3ad   : > { %1630 = vmatprep.subr.mxu1 %v1427_v27 }
 0x3ae   : > { %1631 = vmatpush2.msra.mxu1 %v1426_v11 }
 0x3af   : > { %1632 = vmatprep.subr.mxu1 %v1411_v33 }
 0x3b0   : > { %1633 = vmatpush2.msra.mxu1 %v1410_v21 }
 0x3b1   : > { %1634 = vmatprep.subr.mxu1 %v1395_v38 }
 0x3b2   : > { %1635 = vmatpush2.msra.mxu1 %v1394_v31 }
 0x3b3   : > { %1636 = vmatprep.subr.mxu1 %v1379_v47 }
 0x3b4   : > { %1637 = vmatpush2.msra.mxu1 %v1378_v16 }
 0x3b5   : > { %1638 = vmatprep.subr.mxu1 %v1363_v51 }
 0x3b6   : > { %1639 = vmatpush2.msra.mxu1 %v1362_v55 }
 0x3b7   : > { %1640 = vmatprep.subr.mxu1 %v1341_v26 }
 0x3b8   : > { %1641 = vmatpush2.msra.mxu1 %v1340_v58 }
 0x3b9   : > { %1643 = vmatmul.mubr.f32.vlgmr.msra.gmra.mxu1 %v1510_v7 }
 0x3ba   : > { %1648 = vmatprep.mubr.f32.mxu1 %v1513_v6 }
 0x3bd   : > { %1649 = vmatmul.mubr.f32.gmra.mxu1 %v1512_v5 }
 0x479   : > { %v1644_v56 = vpop.f32.mrf.mxu1 }
 0x47a   : > { %v1678_v34 = vmul.f32 %v1644_v56, %v1644_v56 }
 0x47b   : > { %v1646_v35 = vpop.f32.mrf.mxu1 }
 0x47c   : > { %v1674_v59 = vadd.f32 %v1646_v35, %v1644_v56  ;;  %v1679_v60 = vmul.f32 %v1646_v35, %v1646_v35 }
 0x47d   : > { %v1650_v63 = vpop.f32.mrf.mxu1 }
 0x47e   : > { %1675 = vadd.xlane.f32.xlu0 %v1674_v59  ;;  %v1680_v43 = vadd.f32 %v1679_v60, %v1678_v34  ;;  %v1659_v3 = vmul.f32 %v1650_v63, %v1650_v63 }
 0x47f   : > { %v1652_v1 = vpop.f32.mrf.mxu1 }
 0x480   : > { %v1660_v2 = vmul.f32 %v1652_v1, %v1652_v1  ;;  %1681 = vadd.xlane.f32.xlu1 %v1680_v43  ;;  %v1655_v53 = vadd.f32 %v1652_v1, %v1650_v63 }
 0x482   : > { %1656 = vadd.xlane.f32.xlu0 %v1655_v53  ;;  %v1661_v52 = vadd.f32 %v1660_v2, %v1659_v3 }
 0x486   : > { %1662 = vadd.xlane.f32.xlu0 %v1661_v52 }
 0x507   : > { %v1676_v9 = vpop.xlane.xlu0 %1675 }
 0x508   : > { %v1677_v14 = vmul.f32 0.00390625, %v1676_v9 }
 0x509   : > { %v1682_v41 = vpop.xlane.xlu1 %1681 }
 0x50a   : > { %v1683_v40 = vmul.f32 0.00390625, %v1682_v41  ;;  %v1684_v62 = vmul.f32 %v1677_v14, %v1677_v14  ;;  %v1687_v23 = vsub.f32 %v1644_v56, %v1677_v14  ;;  %v1688_v44 = vsub.f32 %v1646_v35, %v1677_v14 }
 0x50b   : > { %v1657_v15 = vpop.xlane.xlu0 %1656 }
 0x50c   : > { %v1685_v18 = vsub.f32 %v1683_v40, %v1684_v62  ;;  %v1658_v17 = vmul.f32 0.00390625, %v1657_v15 }
 0x50e   : > { %v1686_v49 = vmax.f32 %v1685_v18, 0.0  ;;  %v1665_v20 = vmul.f32 %v1658_v17, %v1658_v17  ;;  %v1668_v11 = vsub.f32 %v1650_v63, %v1658_v17  ;;  %v1669_v32 = vsub.f32 %v1652_v1, %v1658_v17 }
 0x50f   : > { %v1663_v19 = vpop.xlane.xlu0 %1662 }
 0x510   : > { %v1689_v61 = vadd.f32 1e-05, %v1686_v49  ;;  %v1664_v57 = vmul.f32 0.00390625, %v1663_v19 }
 0x512   : > { %1877 = vrsqrt.f32 %v1689_v61  ;;  %v1666_v25 = vsub.f32 %v1664_v57, %v1665_v20 }
 0x514   : > { %v1667_v22 = vmax.f32 %v1666_v25, 0.0 }
 0x516   : > { %v1670_v12 = vadd.f32 1e-05, %v1667_v22 }
 0x518   : > { %1879 = vrsqrt.f32 %v1670_v12 }
 0x51f   : > { %v1878_v24 = vpop.eup %1877 }
 0x520   : > { %v1691_v0 = vmul.f32 %v1878_v24, %v1687_v23  ;;  %v1692_v27 = vmul.f32 %v1878_v24, %v1688_v44 }
 0x522   : > { %v1695_v30 = vmul.f32 0.01, %v1691_v0  ;;  %v1696_v28 = vmul.f32 0.01, %v1692_v27  ;;  %vm1693_vm10 = vcmp.ge.f32.partialorder %v1691_v0, 0.0  ;;  %vm1694_vm11 = vcmp.ge.f32.partialorder %v1692_v27, 0.0 }
 0x524   : > { %v1697_v21 = vsel %vm1693_vm10, %v1691_v0, %v1695_v30  ;;  %v1698_v37 = vsel %vm1694_vm11, %v1692_v27, %v1696_v28 }
 0x525   : > { %v1880_v10 = vpop.eup %1879 }
 0x526   : > { %v1672_v33 = vmul.f32 %v1880_v10, %v1668_v11  ;;  %v1673_v36 = vmul.f32 %v1880_v10, %v1669_v32 }
 0x528   : > { %v1699_v13 = vadd.f32 %v1697_v21, %v1672_v33  ;;  %v1700_v38 = vadd.f32 %v1698_v37, %v1673_v36 }
 0x52a   : > { %vm1701_vm12 = vcmp.ge.f32.partialorder %v1699_v13, 0.0  ;;  %vm1702_vm13 = vcmp.ge.f32.partialorder %v1700_v38, 0.0  ;;  %v1703_v39 = vmul.f32 0.01, %v1699_v13  ;;  %v1704_v42 = vmul.f32 0.01, %v1700_v38 }
 0x52c   : > { %v1705_v31 = vsel %vm1701_vm12, %v1699_v13, %v1703_v39  ;;  %v1706_v8 = vsel %vm1702_vm13, %v1700_v38, %v1704_v42 }
 0x52d   : > { %v1707_v29 = vadd.f32 %v1706_v8, %v1705_v31  ;;  %v1711_v4 = vmul.f32 %v1705_v31, %v1705_v31  ;;  %v1712_v47 = vmul.f32 %v1706_v8, %v1706_v8 }
 0x52f   : > { %1708 = vadd.xlane.f32.xlu1 %v1707_v29  ;;  %v1713_v48 = vadd.f32 %v1712_v47, %v1711_v4 }
 0x531   : > { %1714 = vadd.xlane.f32.xlu0 %v1713_v48 }
 0x5b8   : > { %v1709_v46 = vpop.xlane.xlu1 %1708 }
 0x5b9   : > { %v1710_v16 = vmul.f32 0.00390625, %v1709_v46 }
 0x5ba   : > { %v1715_v50 = vpop.xlane.xlu0 %1714 }
 0x5bb   : > { %v1716_v45 = vmul.f32 0.00390625, %v1715_v50  ;;  %v1717_v51 = vmul.f32 %v1710_v16, %v1710_v16  ;;  %v1720_v58 = vsub.f32 %v1705_v31, %v1710_v16  ;;  %v1721_v7 = vsub.f32 %v1706_v8, %v1710_v16 }
 0x5bd   : > { %v1718_v54 = vsub.f32 %v1716_v45, %v1717_v51 }
 0x5bf   : > { %v1719_v55 = vmax.f32 %v1718_v54, 0.0 }
 0x5c1   : > { %v1722_v26 = vadd.f32 1e-05, %v1719_v55 }
 0x5c3   : > { %1881 = vrsqrt.f32 %v1722_v26 }
 0x5d0   : > { %v1882_v6 = vpop.eup %1881 }
 0x5d1   : > { %v1724_v5 = vmul.f32 %v1882_v6, %v1720_v58  ;;  %v1725_v56 = vmul.f32 %v1882_v6, %v1721_v7 }
 0x5d3   : > { %1726 = vst [vmem:[%s197_s11] sm:$0xff] %v1724_v5  ;;  %1727 = vst [vmem:[%s197_s11 + $0x8] sm:$0xff] %v1725_v56 }
 0x5d4 PF: > { %s14_s15 = sadd.s32 1, %s1889_s15  }
 0x5d5   : > { %p11_p4 = scmp.ge.s32.totalorder %s14_s15, 4  }
 0x5d7   :  { %13 = sbr.rel (!%p11_p4) target bundleno = 1 (0x1), region = 91 }

</bundles_post_ra>
